<compile_context>
chip_gen: v6e
topology: v6e:2x2x1
jax: 0.10.0
libtpu: 0.0.40
codegen_flags: <defaults>
</compile_context>

<pallas_src>
import functools

import jax
import jax.numpy as jnp
from jax import lax
from jax.experimental import pallas as pl
from jax.experimental.pallas import tpu as pltpu

EPS = 1e-5
LANE = 128
TK_TARGET = 2048  # K-tile target for pass 1


def _device_budgets():
    """(vmem_limit_bytes, tile_m_target) per TPU generation; conservative default."""
    try:
        info = pltpu.get_tpu_info()
        vmem_bytes = int(info.vmem_capacity_bytes)
        if vmem_bytes >= 96 * 1024 * 1024:          # v5e / v6e: 128 MiB VMEM
            return 64 * 1024 * 1024, 2048
    except Exception:
        pass
    return 32 * 1024 * 1024, 1024                   # v7x (64 MiB VMEM) / unknown


VMEM_LIMIT, TILE_M_TARGET = _device_budgets()


def _round_up(x, m):
    return (x + m - 1) // m * m


def _choose_tile_m(m):
    if m <= TILE_M_TARGET:
        return _round_up(m, 8)
    return TILE_M_TARGET


def _k_tiling(K):
    k_min = _round_up(K, LANE)
    if k_min <= TK_TARGET:
        return k_min, 1
    k_tiles = -(-k_min // TK_TARGET)
    tk = _round_up(-(-K // k_tiles), LANE)
    return tk, k_tiles


def _pad2d(a, rows, cols):
    r, c = a.shape
    if r == rows and c == cols:          # no-op when already aligned
        return a
    return jnp.pad(a, ((0, rows - r), (0, cols - c)))


# ----------------------------------------------------------------------------
# Pass 1: K-tiled bf16 MXU matmul + per-M-tile BN partial statistics
#         (optionally fused with the projection-shortcut 1x1 conv)
# ----------------------------------------------------------------------------
def _make_conv_stats_kernel(with_proj):
    def kernel(*refs):
        if with_proj:
            (x_ref, w_ref, xs_ref, ws_ref,
             out_ref, sum_ref, ssq_ref,
             pout_ref, psum_ref, pssq_ref, acc_ref) = refs
        else:
            (x_ref, w_ref, out_ref, sum_ref, ssq_ref, acc_ref) = refs

        k = pl.program_id(1)

        @pl.when(k == 0)
        def _():
            acc_ref[...] = jnp.zeros_like(acc_ref)

        acc_ref[...] += jnp.dot(x_ref[...], w_ref[...],
                                preferred_element_type=jnp.float32)

        @pl.when(k == pl.num_programs(1) - 1)
        def _():
            acc = acc_ref[...]
            out_ref[...] = acc.astype(out_ref.dtype)
            sum_ref[...] = jnp.sum(acc, axis=0, keepdims=True).reshape(sum_ref.shape)
            ssq_ref[...] = jnp.sum(acc * acc, axis=0,
                                   keepdims=True).reshape(ssq_ref.shape)
            if with_proj:
                pacc = jnp.dot(xs_ref[...], ws_ref[...],
                               preferred_element_type=jnp.float32)
                pout_ref[...] = pacc.astype(pout_ref.dtype)
                psum_ref[...] = jnp.sum(pacc, axis=0,
                                        keepdims=True).reshape(psum_ref.shape)
                pssq_ref[...] = jnp.sum(pacc * pacc, axis=0,
                                        keepdims=True).reshape(pssq_ref.shape)

    return kernel


def _fold_bn(ssum, ssq, gamma, beta, m_true, c_pad):
    """O(C) glue: training-mode BN (batch mean, biased var) -> per-channel affine."""
    mean = ssum / m_true
    var = jnp.maximum(ssq / m_true - mean * mean, 0.0)
    g = jnp.pad(gamma.astype(jnp.float32), (0, c_pad - gamma.shape[0]))
    b = jnp.pad(beta.astype(jnp.float32), (0, c_pad - beta.shape[0]))
    scale = g * lax.rsqrt(var + EPS)
    shift = b - mean * scale
    return scale.reshape(1, c_pad), shift.reshape(1, c_pad)


def conv_stats(x_flat, w_flat, gamma, beta, *, c_pad, tile_m, m_pad, m_true,
               proj=None, out_dtype=jnp.bfloat16):
    """bf16 matmul (f32 acc) + per-tile BN partial stats, optional fused 1x1 proj.

    Returns (out, scale, shift) or ((out, scale, shift), (pout, pscale, pshift)).
    Zero-padded rows / channels contribute exactly zero to the statistics.
    """
    _, K = x_flat.shape
    tk, k_tiles = _k_tiling(K)
    k_pad = tk * k_tiles
    m_tiles = m_pad // tile_m

    xb = _pad2d(x_flat.astype(jnp.bfloat16), m_pad, k_pad)
    wb = _pad2d(w_flat.astype(jnp.bfloat16), k_pad, c_pad)

    with_proj = proj is not None
    inputs = [xb, wb]
    in_specs = [
        pl.BlockSpec((tile_m, tk), lambda i, k: (i, k)),
        pl.BlockSpec((tk, c_pad), lambda i, k: (k, 0)),
    ]
    out_specs = [
        pl.BlockSpec((tile_m, c_pad), lambda i, k: (i, 0)),
        pl.BlockSpec((1, 1, c_pad), lambda i, k: (i, 0, 0)),
        pl.BlockSpec((1, 1, c_pad), lambda i, k: (i, 0, 0)),
    ]
    out_shape = [
        jax.ShapeDtypeStruct((m_pad, c_pad), out_dtype),
        jax.ShapeDtypeStruct((m_tiles, 1, c_pad), jnp.float32),
        jax.ShapeDtypeStruct((m_tiles, 1, c_pad), jnp.float32),
    ]

    if with_proj:
        xs_flat, ws, gsc, bsc = proj
        cin = xs_flat.shape[1]
        cin_pad = _round_up(cin, LANE)
        xsb = _pad2d(xs_flat.astype(jnp.bfloat16), m_pad, cin_pad)
        wsb = _pad2d(ws.astype(jnp.bfloat16), cin_pad, c_pad)
        inputs += [xsb, wsb]
        in_specs += [
            pl.BlockSpec((tile_m, cin_pad), lambda i, k: (i, 0)),
            pl.BlockSpec((cin_pad, c_pad), lambda i, k: (0, 0)),
        ]
        out_specs += [
            pl.BlockSpec((tile_m, c_pad), lambda i, k: (i, 0)),
            pl.BlockSpec((1, 1, c_pad), lambda i, k: (i, 0, 0)),
            pl.BlockSpec((1, 1, c_pad), lambda i, k: (i, 0, 0)),
        ]
        out_shape += [
            jax.ShapeDtypeStruct((m_pad, c_pad), out_dtype),
            jax.ShapeDtypeStruct((m_tiles, 1, c_pad), jnp.float32),
            jax.ShapeDtypeStruct((m_tiles, 1, c_pad), jnp.float32),
        ]

    results = pl.pallas_call(
        _make_conv_stats_kernel(with_proj),
        grid=(m_tiles, k_tiles),
        in_specs=in_specs,
        out_specs=out_specs,
        out_shape=out_shape,
        scratch_shapes=[pltpu.VMEM((tile_m, c_pad), jnp.float32)],
        compiler_params=pltpu.CompilerParams(
            dimension_semantics=("parallel", "arbitrary"),
            vmem_limit_bytes=VMEM_LIMIT),
    )(*inputs)

    out, ssum, ssq = results[0], results[1], results[2]
    scale, shift = _fold_bn(jnp.sum(ssum, axis=(0, 1)), jnp.sum(ssq, axis=(0, 1)),
                            gamma, beta, m_true, c_pad)
    main = (out, scale, shift)
    if with_proj:
        pout, psum, pssq = results[3], results[4], results[5]
        pscale, pshift = _fold_bn(jnp.sum(psum, axis=(0, 1)),
                                  jnp.sum(pssq, axis=(0, 1)),
                                  gsc, bsc, m_true, c_pad)
        return main, (pout, pscale, pshift)
    return main


# ----------------------------------------------------------------------------
# Pass 2: fused  acc*scale + shift  [+ residual (plain | affine)]  [+ ReLU]
# ----------------------------------------------------------------------------
def _make_bn_kernel(res_mode, relu):
    def finish(y, o_ref):
        if relu:
            y = jnp.maximum(y, 0.0)
        o_ref[...] = y.astype(o_ref.dtype)

    if res_mode == "affine":
        def kernel(a_ref, sc_ref, sh_ref, r_ref, rsc_ref, rsh_ref, o_ref):
            y = a_ref[...].astype(jnp.float32) * sc_ref[...] + sh_ref[...]
            y = y + (r_ref[...].astype(jnp.float32) * rsc_ref[...] + rsh_ref[...])
            finish(y, o_ref)
    elif res_mode == "plain":
        def kernel(a_ref, sc_ref, sh_ref, r_ref, o_ref):
            y = a_ref[...].astype(jnp.float32) * sc_ref[...] + sh_ref[...]
            y = y + r_ref[...].astype(jnp.float32)
            finish(y, o_ref)
    else:
        def kernel(a_ref, sc_ref, sh_ref, o_ref):
            y = a_ref[...].astype(jnp.float32) * sc_ref[...] + sh_ref[...]
            finish(y, o_ref)
    return kernel


def bn_apply(acc, scale, shift, *, tile_m, relu, out_dtype,
             residual=None, residual_affine=None):
    m_pad, c_pad = acc.shape
    if residual is None:
        res_mode = None
    elif residual_affine is None:
        res_mode = "plain"
    else:
        res_mode = "affine"

    inputs = [acc, scale, shift]
    in_specs = [
        pl.BlockSpec((tile_m, c_pad), lambda i: (i, 0)),
        pl.BlockSpec((1, c_pad), lambda i: (0, 0)),
        pl.BlockSpec((1, c_pad), lambda i: (0, 0)),
    ]
    if res_mode is not None:
        inputs.append(residual)
        in_specs.append(pl.BlockSpec((tile_m, c_pad), lambda i: (i, 0)))
    if res_mode == "affine":
        rsc, rsh = residual_affine
        inputs += [rsc, rsh]
        in_specs += [pl.BlockSpec((1, c_pad), lambda i: (0, 0)),
                     pl.BlockSpec((1, c_pad), lambda i: (0, 0))]

    return pl.pallas_call(
        _make_bn_kernel(res_mode, relu),
        grid=(m_pad // tile_m,),
        in_specs=in_specs,
        out_specs=pl.BlockSpec((tile_m, c_pad), lambda i: (i, 0)),
        out_shape=jax.ShapeDtypeStruct((m_pad, c_pad), out_dtype),
        compiler_params=pltpu.CompilerParams(
            dimension_semantics=("parallel",),
            vmem_limit_bytes=VMEM_LIMIT),
    )(*inputs)


# ----------------------------------------------------------------------------
# Plain-JAX glue: im2col patch extraction (bf16) + weight flattening
# ----------------------------------------------------------------------------
def im2col_3x3(x_nhwc, stride):
    N, H, W, C = x_nhwc.shape
    xp = jnp.pad(x_nhwc, ((0, 0), (1, 1), (1, 1), (0, 0)))
    Ho = (H + 2 - 3) // stride + 1
    Wo = (W + 2 - 3) // stride + 1
    patches = []
    for kh in range(3):
        for kw in range(3):
            patches.append(
                xp[:, kh:kh + (Ho - 1) * stride + 1:stride,
                      kw:kw + (Wo - 1) * stride + 1:stride, :])
    p = jnp.concatenate(patches, axis=-1)            # (N, Ho, Wo, 9*C), bf16
    return p.reshape(N * Ho * Wo, 9 * C), Ho, Wo


def flatten_w3x3(w_oihw):
    # (Cout, Cin, 3, 3) -> (kh, kw, Cin, Cout) -> (9*Cin, Cout), matching im2col.
    cin = w_oihw.shape[1]
    cout = w_oihw.shape[0]
    return jnp.transpose(w_oihw, (2, 3, 1, 0)).reshape(9 * cin, cout)


# ----------------------------------------------------------------------------
# BasicBlock forward (Pallas-backed)
# ----------------------------------------------------------------------------
def basic_block_forward(x_nchw, params, stride):
    # bf16 activations from the start: the 9x im2col tensor is built in bf16.
    x = jnp.transpose(x_nchw, (0, 2, 3, 1)).astype(jnp.bfloat16)   # NHWC
    N, H, W, cin = x.shape
    planes = params["w1"].shape[0]
    c_pad = max(_round_up(planes, LANE), LANE)
    projection = (stride != 1 or cin != planes)

    # conv1 (3x3, stride, pad=1) + bn1 stats, fused with projection 1x1 conv + bn
    p1, Ho, Wo = im2col_3x3(x, stride)
    M = N * Ho * Wo
    tile_m = _choose_tile_m(M)
    m_pad = _round_up(M, tile_m)

    proj_arg = None
    if projection:
        xs = x[:, ::stride, ::stride, :].reshape(M, cin)            # bf16
        wsc = params["wsc"][:, :, 0, 0].T                           # (Cin, planes)
        proj_arg = (xs, wsc, params["gsc"], params["bsc"])

    r1 = conv_stats(p1, flatten_w3x3(params["w1"]), params["g1"], params["b1"],
                    c_pad=c_pad, tile_m=tile_m, m_pad=m_pad, m_true=M,
                    proj=proj_arg, out_dtype=jnp.bfloat16)
    if projection:
        (acc1, sc1, sh1), (res_acc, res_sc, res_sh) = r1
        res_affine = (res_sc, res_sh)
    else:
        acc1, sc1, sh1 = r1
        res_acc = _pad2d(x.reshape(M, cin), m_pad, c_pad)           # bf16 identity
        res_affine = None

    # bn1 affine + ReLU, emitted in bf16 (conv2 consumes bf16 anyway)
    h1 = bn_apply(acc1, sc1, sh1, tile_m=tile_m, relu=True,
                  out_dtype=jnp.bfloat16)

    # conv2 (3x3, stride=1, pad=1) + bn2 stats
    h1_nhwc = h1[:M, :planes].reshape(N, Ho, Wo, planes)            # bf16
    p2, _, _ = im2col_3x3(h1_nhwc, 1)
    acc2, sc2, sh2 = conv_stats(
        p2, flatten_w3x3(params["w2"]), params["g2"], params["b2"],
        c_pad=c_pad, tile_m=tile_m, m_pad=m_pad, m_true=M,
        out_dtype=jnp.bfloat16)

    # bn2 affine + residual add (+ its folded BN if projection) + ReLU, f32 out
    out = bn_apply(acc2, sc2, sh2, tile_m=tile_m, relu=True,
                   out_dtype=jnp.float32,
                   residual=res_acc, residual_affine=res_affine)

    out = out[:M, :planes].reshape(N, Ho, Wo, planes)
    return jnp.transpose(out, (0, 3, 1, 2))                         # back to NCHW


# ----------------------------------------------------------------------------
# Pure-JAX references (correctness check only)
# ----------------------------------------------------------------------------
def _conv_ref(x_nhwc, w_oihw, stride, padding, bf16):
    w_hwio = jnp.transpose(w_oihw, (2, 3, 1, 0))
    if bf16:
        x_nhwc = x_nhwc.astype(jnp.bfloat16)
        w_hwio = w_hwio.astype(jnp.bfloat16)
    return lax.conv_general_dilated(
        x_nhwc, w_hwio, (stride, stride), padding,
        dimension_numbers=("NHWC", "HWIO", "NHWC"),
        preferred_element_type=jnp.float32)


def _bn_ref(y, g, b):
    m = jnp.mean(y, axis=(0, 1, 2), keepdims=True)
    v = jnp.mean(jnp.square(y - m), axis=(0, 1, 2), keepdims=True)
    return (y - m) * lax.rsqrt(v + EPS) * g + b


def basic_block_ref(x_nchw, params, stride, bf16=False):
    x = jnp.transpose(x_nchw, (0, 2, 3, 1)).astype(jnp.float32)
    planes = params["w1"].shape[0]
    h = jax.nn.relu(_bn_ref(
        _conv_ref(x, params["w1"], stride, [(1, 1), (1, 1)], bf16),
        params["g1"], params["b1"]))
    o = _bn_ref(_conv_ref(h, params["w2"], 1, [(1, 1), (1, 1)], bf16),
                params["g2"], params["b2"])
    if stride != 1 or x.shape[-1] != planes:
        s = _bn_ref(_conv_ref(x, params["wsc"], stride, [(0, 0), (0, 0)], bf16),
                    params["gsc"], params["bsc"])
    else:
        s = x
    o = jax.nn.relu(o + s)
    return jnp.transpose(o, (0, 3, 1, 2))


# ----------------------------------------------------------------------------
if __name__ == "__main__":
    root_key = jax.random.PRNGKey(0)

    def make_params(key, in_planes, planes, projection):
        ks = jax.random.split(key, 9)
        p = {
            "w1": 0.1 * jax.random.normal(ks[0], (planes, in_planes, 3, 3), jnp.float32),
            "w2": 0.1 * jax.random.normal(ks[1], (planes, planes, 3, 3), jnp.float32),
            "g1": 1.0 + 0.1 * jax.random.normal(ks[2], (planes,), jnp.float32),
            "b1": 0.1 * jax.random.normal(ks[3], (planes,), jnp.float32),
            "g2": 1.0 + 0.1 * jax.random.normal(ks[4], (planes,), jnp.float32),
            "b2": 0.1 * jax.random.normal(ks[5], (planes,), jnp.float32),
        }
        if projection:
            p["wsc"] = 0.1 * jax.random.normal(ks[6], (planes, in_planes, 1, 1), jnp.float32)
            p["gsc"] = 1.0 + 0.1 * jax.random.normal(ks[7], (planes,), jnp.float32)
            p["bsc"] = 0.1 * jax.random.normal(ks[8], (planes,), jnp.float32)
        return p

    configs = [
        # (N, in_planes, H, W, planes, stride)
        (2, 4, 16, 16, 8, 2),    # projection shortcut (fused 1x1 conv + BN)
        (2, 8, 16, 16, 8, 1),    # identity shortcut (plain bf16 residual)
    ]
    for idx, (N, cin, H, W, planes, stride) in enumerate(configs):
        kp, kx = jax.random.split(jax.random.fold_in(root_key, idx))
        projection = (stride != 1 or cin != planes)
        params = make_params(kp, cin, planes, projection)
        x = jax.random.normal(kx, (N, cin, H, W), jnp.float32)

        fwd = jax.jit(functools.partial(basic_block_forward, stride=stride))
        out = jax.block_until_ready(fwd(x, params))

        Ho = (H - 1) // stride + 1
        Wo = (W - 1) // stride + 1
        assert out.shape == (N, planes, Ho, Wo), out.shape

        # bf16 MXU operands + bf16 intermediate streams with f32 accumulation /
        # statistics: compare against a matched-precision reference (tight) and
        # the full-f32 reference (loose).
        ref_bf16 = jax.block_until_ready(basic_block_ref(x, params, stride, bf16=True))
        ref_f32 = jax.block_until_ready(basic_block_ref(x, params, stride, bf16=False))
        assert jnp.allclose(out, ref_bf16, atol=3e-2, rtol=3e-2), (
            float(jnp.max(jnp.abs(out - ref_bf16))))
        assert jnp.allclose(out, ref_f32, atol=6e-2, rtol=6e-2), (
            float(jnp.max(jnp.abs(out - ref_f32))))

    print("KERNEL_OK")
</pallas_src>

<mosaic_0001>
module attributes {stable_mosaic.version = 11 : i64} {
  func.func @kernel(%arg0: i32, %arg1: memref<128x128xbf16, #tpu.memory_space<vmem>>, %arg2: memref<1x128xf32, #tpu.memory_space<vmem>>, %arg3: memref<1x128xf32, #tpu.memory_space<vmem>>, %arg4: memref<128x128xbf16, #tpu.memory_space<vmem>>) attributes {dimension_semantics = [#tpu.dimension_semantics<parallel>], iteration_bounds = array<i64: 1>, scalar_prefetch = 0 : i64, scratch_operands = 0 : i64, tpu.core_type = #tpu.core_type<tc>, window_params = [{transform_indices = @transform_0, window_bounds = array<i64: 128, 128>}, {pipeline_mode = #tpu.pipeline_mode<synchronous>, transform_indices = @transform_1, window_bounds = array<i64: 1, 128>}, {pipeline_mode = #tpu.pipeline_mode<synchronous>, transform_indices = @transform_2, window_bounds = array<i64: 1, 128>}, {transform_indices = @transform_3, window_bounds = array<i64: 128, 128>}]} {
    %c0 = arith.constant 0 : index
    %c0_0 = arith.constant 0 : index
    %0 = vector.load %arg1[%c0, %c0_0] : memref<128x128xbf16, #tpu.memory_space<vmem>>, vector<128x128xbf16>
    %1 = arith.extf %0 : vector<128x128xbf16> to vector<128x128xf32>
    %c0_1 = arith.constant 0 : index
    %c0_2 = arith.constant 0 : index
    %2 = vector.load %arg2[%c0_1, %c0_2] : memref<1x128xf32, #tpu.memory_space<vmem>>, vector<1x128xf32>
    %3 = vector.broadcast %2 : vector<1x128xf32> to vector<128x128xf32>
    %4 = arith.mulf %1, %3 : vector<128x128xf32>
    %c0_3 = arith.constant 0 : index
    %c0_4 = arith.constant 0 : index
    %5 = vector.load %arg3[%c0_3, %c0_4] : memref<1x128xf32, #tpu.memory_space<vmem>>, vector<1x128xf32>
    %6 = vector.broadcast %5 : vector<1x128xf32> to vector<128x128xf32>
    %7 = arith.addf %4, %6 : vector<128x128xf32>
    %cst = arith.constant 0.000000e+00 : f32
    %8 = vector.broadcast %cst : f32 to vector<128x128xf32>
    %9 = arith.maximumf %7, %8 : vector<128x128xf32>
    %10 = arith.truncf %9 : vector<128x128xf32> to vector<128x128xbf16>
    %c0_5 = arith.constant 0 : index
    %c0_6 = arith.constant 0 : index
    %11 = vector.load %arg4[%c0_5, %c0_6] : memref<128x128xbf16, #tpu.memory_space<vmem>>, vector<128x128xbf16>
    tpu.vector_store %arg4[%c0_5, %c0_6], %10 {strides = array<i32>} : memref<128x128xbf16, #tpu.memory_space<vmem>>, vector<128x128xbf16>,
    return
  }
  func.func @transform_0(%arg0: i32) -> (i32, i32) {
    %c0_i32 = arith.constant 0 : i32
    %c0_i32_0 = arith.constant 0 : i32
    return %arg0, %c0_i32 : i32, i32
  }
  func.func @transform_1(%arg0: i32) -> (i32, i32) {
    %c0_i32 = arith.constant 0 : i32
    %c0_i32_0 = arith.constant 0 : i32
    %c0_i32_1 = arith.constant 0 : i32
    return %c0_i32, %c0_i32_0 : i32, i32
  }
  func.func @transform_2(%arg0: i32) -> (i32, i32) {
    %c0_i32 = arith.constant 0 : i32
    %c0_i32_0 = arith.constant 0 : i32
    %c0_i32_1 = arith.constant 0 : i32
    return %c0_i32, %c0_i32_0 : i32, i32
  }
  func.func @transform_3(%arg0: i32) -> (i32, i32) {
    %c0_i32 = arith.constant 0 : i32
    %c0_i32_0 = arith.constant 0 : i32
    return %arg0, %c0_i32 : i32, i32
  }
}

module attributes {stable_mosaic.version = 11 : i64} {
  func.func @kernel(%arg0: i32, %arg1: i32, %arg2: memref<128x128xbf16, #tpu.memory_space<vmem>>, %arg3: memref<128x128xbf16, #tpu.memory_space<vmem>>, %arg4: memref<128x128xbf16, #tpu.memory_space<vmem>>, %arg5: memref<128x128xbf16, #tpu.memory_space<vmem>>, %arg6: memref<128x128xbf16, #tpu.memory_space<vmem>>, %arg7: memref<1x1x128xf32, #tpu.memory_space<vmem>>, %arg8: memref<1x1x128xf32, #tpu.memory_space<vmem>>, %arg9: memref<128x128xbf16, #tpu.memory_space<vmem>>, %arg10: memref<1x1x128xf32, #tpu.memory_space<vmem>>, %arg11: memref<1x1x128xf32, #tpu.memory_space<vmem>>, %arg12: memref<128x128xf32, #tpu.memory_space<vmem>>) attributes {dimension_semantics = [#tpu.dimension_semantics<parallel>, #tpu.dimension_semantics<arbitrary>], iteration_bounds = array<i64: 1, 1>, scalar_prefetch = 0 : i64, scratch_operands = 1 : i64, tpu.core_type = #tpu.core_type<tc>, window_params = [{transform_indices = @transform_0, window_bounds = array<i64: 128, 128>}, {transform_indices = @transform_1, window_bounds = array<i64: 128, 128>}, {transform_indices = @transform_2, window_bounds = array<i64: 128, 128>}, {pipeline_mode = #tpu.pipeline_mode<synchronous>, transform_indices = @transform_3, window_bounds = array<i64: 128, 128>}, {transform_indices = @transform_4, window_bounds = array<i64: 128, 128>}, {transform_indices = @transform_5, window_bounds = array<i64: 1, 1, 128>}, {transform_indices = @transform_6, window_bounds = array<i64: 1, 1, 128>}, {transform_indices = @transform_7, window_bounds = array<i64: 128, 128>}, {transform_indices = @transform_8, window_bounds = array<i64: 1, 1, 128>}, {transform_indices = @transform_9, window_bounds = array<i64: 1, 1, 128>}]} {
    %c0_i32 = arith.constant 0 : i32
    %0 = arith.cmpi eq, %arg1, %c0_i32 : i32
    %1 = arith.extui %0 : i1 to i32
    %c0_i32_0 = arith.constant 0 : i32
    %2 = arith.cmpi ne, %1, %c0_i32_0 : i32
    scf.if %2 {
      %cst_10 = arith.constant 0.000000e+00 : f32
      %12 = vector.broadcast %cst_10 : f32 to vector<128x128xf32>
      %c0_11 = arith.constant 0 : index
      %c0_12 = arith.constant 0 : index
      %13 = vector.load %arg12[%c0_11, %c0_12] : memref<128x128xf32, #tpu.memory_space<vmem>>, vector<128x128xf32>
      tpu.vector_store %arg12[%c0_11, %c0_12], %12 {strides = array<i32>} : memref<128x128xf32, #tpu.memory_space<vmem>>, vector<128x128xf32>,
    } else {
    }
    %c0 = arith.constant 0 : index
    %c0_1 = arith.constant 0 : index
    %3 = vector.load %arg12[%c0, %c0_1] : memref<128x128xf32, #tpu.memory_space<vmem>>, vector<128x128xf32>
    %c0_2 = arith.constant 0 : index
    %c0_3 = arith.constant 0 : index
    %4 = vector.load %arg2[%c0_2, %c0_3] : memref<128x128xbf16, #tpu.memory_space<vmem>>, vector<128x128xbf16>
    %c0_4 = arith.constant 0 : index
    %c0_5 = arith.constant 0 : index
    %5 = vector.load %arg3[%c0_4, %c0_5] : memref<128x128xbf16, #tpu.memory_space<vmem>>, vector<128x128xbf16>
    %cst = arith.constant dense<0.000000e+00> : vector<128x128xf32>
    %6 = tpu.matmul %4, %5, %cst {dimension_numbers = #tpu.dot_dimension_numbers<[1], [0], [0], [1], [0, 0, 1, 1], [], []>} : vector<128x128xbf16>, vector<128x128xbf16>, vector<128x128xf32> -> vector<128x128xf32>
    %7 = arith.addf %3, %6 : vector<128x128xf32>
    %c0_6 = arith.constant 0 : index
    %c0_7 = arith.constant 0 : index
    %8 = vector.load %arg12[%c0_6, %c0_7] : memref<128x128xf32, #tpu.memory_space<vmem>>, vector<128x128xf32>
    tpu.vector_store %arg12[%c0_6, %c0_7], %7 {strides = array<i32>} : memref<128x128xf32, #tpu.memory_space<vmem>>, vector<128x128xf32>,
    %c0_i32_8 = arith.constant 0 : i32
    %9 = arith.cmpi eq, %arg1, %c0_i32_8 : i32
    %10 = arith.extui %9 : i1 to i32
    %c0_i32_9 = arith.constant 0 : i32
    %11 = arith.cmpi ne, %10, %c0_i32_9 : i32
    scf.if %11 {
      %c0_10 = arith.constant 0 : index
      %c0_11 = arith.constant 0 : index
      %12 = vector.load %arg12[%c0_10, %c0_11] : memref<128x128xf32, #tpu.memory_space<vmem>>, vector<128x128xf32>
      %13 = arith.truncf %12 : vector<128x128xf32> to vector<128x128xbf16>
      %c0_12 = arith.constant 0 : index
      %c0_13 = arith.constant 0 : index
      %14 = vector.load %arg6[%c0_12, %c0_13] : memref<128x128xbf16, #tpu.memory_space<vmem>>, vector<128x128xbf16>
      tpu.vector_store %arg6[%c0_12, %c0_13], %13 {strides = array<i32>} : memref<128x128xbf16, #tpu.memory_space<vmem>>, vector<128x128xbf16>,
      %cst_14 = arith.constant dense<0.000000e+00> : vector<128xf32>
      %15 = vector.multi_reduction <add>, %12, %cst_14 [0] : vector<128x128xf32> to vector<128xf32>
      %16 = vector.shape_cast %15 : vector<128xf32> to vector<1x128xf32>
      %17 = vector.shape_cast %16 : vector<1x128xf32> to vector<1x1x128xf32>
      %c0_15 = arith.constant 0 : index
      %c0_16 = arith.constant 0 : index
      %c0_17 = arith.constant 0 : index
      %18 = vector.load %arg7[%c0_15, %c0_16, %c0_17] : memref<1x1x128xf32, #tpu.memory_space<vmem>>, vector<1x1x128xf32>
      tpu.vector_store %arg7[%c0_15, %c0_16, %c0_17], %17 {strides = array<i32>} : memref<1x1x128xf32, #tpu.memory_space<vmem>>, vector<1x1x128xf32>,
      %19 = arith.mulf %12, %12 : vector<128x128xf32>
      %cst_18 = arith.constant dense<0.000000e+00> : vector<128xf32>
      %20 = vector.multi_reduction <add>, %19, %cst_18 [0] : vector<128x128xf32> to vector<128xf32>
      %21 = vector.shape_cast %20 : vector<128xf32> to vector<1x128xf32>
      %22 = vector.shape_cast %21 : vector<1x128xf32> to vector<1x1x128xf32>
      %c0_19 = arith.constant 0 : index
      %c0_20 = arith.constant 0 : index
      %c0_21 = arith.constant 0 : index
      %23 = vector.load %arg8[%c0_19, %c0_20, %c0_21] : memref<1x1x128xf32, #tpu.memory_space<vmem>>, vector<1x1x128xf32>
      tpu.vector_store %arg8[%c0_19, %c0_20, %c0_21], %22 {strides = array<i32>} : memref<1x1x128xf32, #tpu.memory_space<vmem>>, vector<1x1x128xf32>,
      %c0_22 = arith.constant 0 : index
      %c0_23 = arith.constant 0 : index
      %24 = vector.load %arg4[%c0_22, %c0_23] : memref<128x128xbf16, #tpu.memory_space<vmem>>, vector<128x128xbf16>
      %c0_24 = arith.constant 0 : index
      %c0_25 = arith.constant 0 : index
      %25 = vector.load %arg5[%c0_24, %c0_25] : memref<128x128xbf16, #tpu.memory_space<vmem>>, vector<128x128xbf16>
      %cst_26 = arith.constant dense<0.000000e+00> : vector<128x128xf32>
      %26 = tpu.matmul %24, %25, %cst_26 {dimension_numbers = #tpu.dot_dimension_numbers<[1], [0], [0], [1], [0, 0, 1, 1], [], []>} : vector<128x128xbf16>, vector<128x128xbf16>, vector<128x128xf32> -> vector<128x128xf32>
      %27 = arith.truncf %26 : vector<128x128xf32> to vector<128x128xbf16>
      %c0_27 = arith.constant 0 : index
      %c0_28 = arith.constant 0 : index
      %28 = vector.load %arg9[%c0_27, %c0_28] : memref<128x128xbf16, #tpu.memory_space<vmem>>, vector<128x128xbf16>
      tpu.vector_store %arg9[%c0_27, %c0_28], %27 {strides = array<i32>} : memref<128x128xbf16, #tpu.memory_space<vmem>>, vector<128x128xbf16>,
      %cst_29 = arith.constant dense<0.000000e+00> : vector<128xf32>
      %29 = vector.multi_reduction <add>, %26, %cst_29 [0] : vector<128x128xf32> to vector<128xf32>
      %30 = vector.shape_cast %29 : vector<128xf32> to vector<1x128xf32>
      %31 = vector.shape_cast %30 : vector<1x128xf32> to vector<1x1x128xf32>
      %c0_30 = arith.constant 0 : index
      %c0_31 = arith.constant 0 : index
      %c0_32 = arith.constant 0 : index
      %32 = vector.load %arg10[%c0_30, %c0_31, %c0_32] : memref<1x1x128xf32, #tpu.memory_space<vmem>>, vector<1x1x128xf32>
      tpu.vector_store %arg10[%c0_30, %c0_31, %c0_32], %31 {strides = array<i32>} : memref<1x1x128xf32, #tpu.memory_space<vmem>>, vector<1x1x128xf32>,
      %33 = arith.mulf %26, %26 : vector<128x128xf32>
      %cst_33 = arith.constant dense<0.000000e+00> : vector<128xf32>
      %34 = vector.multi_reduction <add>, %33, %cst_33 [0] : vector<128x128xf32> to vector<128xf32>
      %35 = vector.shape_cast %34 : vector<128xf32> to vector<1x128xf32>
      %36 = vector.shape_cast %35 : vector<1x128xf32> to vector<1x1x128xf32>
      %c0_34 = arith.constant 0 : index
      %c0_35 = arith.constant 0 : index
      %c0_36 = arith.constant 0 : index
      %37 = vector.load %arg11[%c0_34, %c0_35, %c0_36] : memref<1x1x128xf32, #tpu.memory_space<vmem>>, vector<1x1x128xf32>
      tpu.vector_store %arg11[%c0_34, %c0_35, %c0_36], %36 {strides = array<i32>} : memref<1x1x128xf32, #tpu.memory_space<vmem>>, vector<1x1x128xf32>,
    } else {
    }
    return
  }
  func.func @transform_0(%arg0: i32, %arg1: i32) -> (i32, i32) {
    %c0_i32 = arith.constant 0 : i32
    return %arg0, %arg1 : i32, i32
  }
  func.func @transform_1(%arg0: i32, %arg1: i32) -> (i32, i32) {
    %c0_i32 = arith.constant 0 : i32
    %c0_i32_0 = arith.constant 0 : i32
    return %arg1, %c0_i32 : i32, i32
  }
  func.func @transform_2(%arg0: i32, %arg1: i32) -> (i32, i32) {
    %c0_i32 = arith.constant 0 : i32
    %c0_i32_0 = arith.constant 0 : i32
    return %arg0, %c0_i32 : i32, i32
  }
  func.func @transform_3(%arg0: i32, %arg1: i32) -> (i32, i32) {
    %c0_i32 = arith.constant 0 : i32
    %c0_i32_0 = arith.constant 0 : i32
    %c0_i32_1 = arith.constant 0 : i32
    return %c0_i32, %c0_i32_0 : i32, i32
  }
  func.func @transform_4(%arg0: i32, %arg1: i32) -> (i32, i32) {
    %c0_i32 = arith.constant 0 : i32
    %c0_i32_0 = arith.constant 0 : i32
    return %arg0, %c0_i32 : i32, i32
  }
  func.func @transform_5(%arg0: i32, %arg1: i32) -> (i32, i32, i32) {
    %c0_i32 = arith.constant 0 : i32
    %c0_i32_0 = arith.constant 0 : i32
    %c0_i32_1 = arith.constant 0 : i32
    return %arg0, %c0_i32, %c0_i32_0 : i32, i32, i32
  }
  func.func @transform_6(%arg0: i32, %arg1: i32) -> (i32, i32, i32) {
    %c0_i32 = arith.constant 0 : i32
    %c0_i32_0 = arith.constant 0 : i32
    %c0_i32_1 = arith.constant 0 : i32
    return %arg0, %c0_i32, %c0_i32_0 : i32, i32, i32
  }
  func.func @transform_7(%arg0: i32, %arg1: i32) -> (i32, i32) {
    %c0_i32 = arith.constant 0 : i32
    %c0_i32_0 = arith.constant 0 : i32
    return %arg0, %c0_i32 : i32, i32
  }
  func.func @transform_8(%arg0: i32, %arg1: i32) -> (i32, i32, i32) {
    %c0_i32 = arith.constant 0 : i32
    %c0_i32_0 = arith.constant 0 : i32
    %c0_i32_1 = arith.constant 0 : i32
    return %arg0, %c0_i32, %c0_i32_0 : i32, i32, i32
  }
  func.func @transform_9(%arg0: i32, %arg1: i32) -> (i32, i32, i32) {
    %c0_i32 = arith.constant 0 : i32
    %c0_i32_0 = arith.constant 0 : i32
    %c0_i32_1 = arith.constant 0 : i32
    return %arg0, %c0_i32, %c0_i32_0 : i32, i32, i32
  }
}

module attributes {stable_mosaic.version = 11 : i64} {
  func.func @kernel(%arg0: i32, %arg1: memref<128x128xbf16, #tpu.memory_space<vmem>>, %arg2: memref<1x128xf32, #tpu.memory_space<vmem>>, %arg3: memref<1x128xf32, #tpu.memory_space<vmem>>, %arg4: memref<128x128xbf16, #tpu.memory_space<vmem>>, %arg5: memref<1x128xf32, #tpu.memory_space<vmem>>, %arg6: memref<1x128xf32, #tpu.memory_space<vmem>>, %arg7: memref<128x128xf32, #tpu.memory_space<vmem>>) attributes {dimension_semantics = [#tpu.dimension_semantics<parallel>], iteration_bounds = array<i64: 1>, scalar_prefetch = 0 : i64, scratch_operands = 0 : i64, tpu.core_type = #tpu.core_type<tc>, window_params = [{transform_indices = @transform_0, window_bounds = array<i64: 128, 128>}, {pipeline_mode = #tpu.pipeline_mode<synchronous>, transform_indices = @transform_1, window_bounds = array<i64: 1, 128>}, {pipeline_mode = #tpu.pipeline_mode<synchronous>, transform_indices = @transform_2, window_bounds = array<i64: 1, 128>}, {transform_indices = @transform_3, window_bounds = array<i64: 128, 128>}, {pipeline_mode = #tpu.pipeline_mode<synchronous>, transform_indices = @transform_4, window_bounds = array<i64: 1, 128>}, {pipeline_mode = #tpu.pipeline_mode<synchronous>, transform_indices = @transform_5, window_bounds = array<i64: 1, 128>}, {transform_indices = @transform_6, window_bounds = array<i64: 128, 128>}]} {
    %c0 = arith.constant 0 : index
    %c0_0 = arith.constant 0 : index
    %0 = vector.load %arg1[%c0, %c0_0] : memref<128x128xbf16, #tpu.memory_space<vmem>>, vector<128x128xbf16>
    %1 = arith.extf %0 : vector<128x128xbf16> to vector<128x128xf32>
    %c0_1 = arith.constant 0 : index
    %c0_2 = arith.constant 0 : index
    %2 = vector.load %arg2[%c0_1, %c0_2] : memref<1x128xf32, #tpu.memory_space<vmem>>, vector<1x128xf32>
    %3 = vector.broadcast %2 : vector<1x128xf32> to vector<128x128xf32>
    %4 = arith.mulf %1, %3 : vector<128x128xf32>
    %c0_3 = arith.constant 0 : index
    %c0_4 = arith.constant 0 : index
    %5 = vector.load %arg3[%c0_3, %c0_4] : memref<1x128xf32, #tpu.memory_space<vmem>>, vector<1x128xf32>
    %6 = vector.broadcast %5 : vector<1x128xf32> to vector<128x128xf32>
    %7 = arith.addf %4, %6 : vector<128x128xf32>
    %c0_5 = arith.constant 0 : index
    %c0_6 = arith.constant 0 : index
    %8 = vector.load %arg4[%c0_5, %c0_6] : memref<128x128xbf16, #tpu.memory_space<vmem>>, vector<128x128xbf16>
    %9 = arith.extf %8 : vector<128x128xbf16> to vector<128x128xf32>
    %c0_7 = arith.constant 0 : index
    %c0_8 = arith.constant 0 : index
    %10 = vector.load %arg5[%c0_7, %c0_8] : memref<1x128xf32, #tpu.memory_space<vmem>>, vector<1x128xf32>
    %11 = vector.broadcast %10 : vector<1x128xf32> to vector<128x128xf32>
    %12 = arith.mulf %9, %11 : vector<128x128xf32>
    %c0_9 = arith.constant 0 : index
    %c0_10 = arith.constant 0 : index
    %13 = vector.load %arg6[%c0_9, %c0_10] : memref<1x128xf32, #tpu.memory_space<vmem>>, vector<1x128xf32>
    %14 = vector.broadcast %13 : vector<1x128xf32> to vector<128x128xf32>
    %15 = arith.addf %12, %14 : vector<128x128xf32>
    %16 = arith.addf %7, %15 : vector<128x128xf32>
    %cst = arith.constant 0.000000e+00 : f32
    %17 = vector.broadcast %cst : f32 to vector<128x128xf32>
    %18 = arith.maximumf %16, %17 : vector<128x128xf32>
    %c0_11 = arith.constant 0 : index
    %c0_12 = arith.constant 0 : index
    %19 = vector.load %arg7[%c0_11, %c0_12] : memref<128x128xf32, #tpu.memory_space<vmem>>, vector<128x128xf32>
    tpu.vector_store %arg7[%c0_11, %c0_12], %18 {strides = array<i32>} : memref<128x128xf32, #tpu.memory_space<vmem>>, vector<128x128xf32>,
    return
  }
  func.func @transform_0(%arg0: i32) -> (i32, i32) {
    %c0_i32 = arith.constant 0 : i32
    %c0_i32_0 = arith.constant 0 : i32
    return %arg0, %c0_i32 : i32, i32
  }
  func.func @transform_1(%arg0: i32) -> (i32, i32) {
    %c0_i32 = arith.constant 0 : i32
    %c0_i32_0 = arith.constant 0 : i32
    %c0_i32_1 = arith.constant 0 : i32
    return %c0_i32, %c0_i32_0 : i32, i32
  }
  func.func @transform_2(%arg0: i32) -> (i32, i32) {
    %c0_i32 = arith.constant 0 : i32
    %c0_i32_0 = arith.constant 0 : i32
    %c0_i32_1 = arith.constant 0 : i32
    return %c0_i32, %c0_i32_0 : i32, i32
  }
  func.func @transform_3(%arg0: i32) -> (i32, i32) {
    %c0_i32 = arith.constant 0 : i32
    %c0_i32_0 = arith.constant 0 : i32
    return %arg0, %c0_i32 : i32, i32
  }
  func.func @transform_4(%arg0: i32) -> (i32, i32) {
    %c0_i32 = arith.constant 0 : i32
    %c0_i32_0 = arith.constant 0 : i32
    %c0_i32_1 = arith.constant 0 : i32
    return %c0_i32, %c0_i32_0 : i32, i32
  }
  func.func @transform_5(%arg0: i32) -> (i32, i32) {
    %c0_i32 = arith.constant 0 : i32
    %c0_i32_0 = arith.constant 0 : i32
    %c0_i32_1 = arith.constant 0 : i32
    return %c0_i32, %c0_i32_0 : i32, i32
  }
  func.func @transform_6(%arg0: i32) -> (i32, i32) {
    %c0_i32 = arith.constant 0 : i32
    %c0_i32_0 = arith.constant 0 : i32
    return %arg0, %c0_i32 : i32, i32
  }
}

module attributes {stable_mosaic.version = 11 : i64} {
  func.func @kernel(%arg0: i32, %arg1: i32, %arg2: memref<128x128xbf16, #tpu.memory_space<vmem>>, %arg3: memref<128x128xbf16, #tpu.memory_space<vmem>>, %arg4: memref<128x128xbf16, #tpu.memory_space<vmem>>, %arg5: memref<1x1x128xf32, #tpu.memory_space<vmem>>, %arg6: memref<1x1x128xf32, #tpu.memory_space<vmem>>, %arg7: memref<128x128xf32, #tpu.memory_space<vmem>>) attributes {dimension_semantics = [#tpu.dimension_semantics<parallel>, #tpu.dimension_semantics<arbitrary>], iteration_bounds = array<i64: 1, 1>, scalar_prefetch = 0 : i64, scratch_operands = 1 : i64, tpu.core_type = #tpu.core_type<tc>, window_params = [{transform_indices = @transform_0, window_bounds = array<i64: 128, 128>}, {transform_indices = @transform_1, window_bounds = array<i64: 128, 128>}, {transform_indices = @transform_2, window_bounds = array<i64: 128, 128>}, {transform_indices = @transform_3, window_bounds = array<i64: 1, 1, 128>}, {transform_indices = @transform_4, window_bounds = array<i64: 1, 1, 128>}]} {
    %c0_i32 = arith.constant 0 : i32
    %0 = arith.cmpi eq, %arg1, %c0_i32 : i32
    %1 = arith.extui %0 : i1 to i32
    %c0_i32_0 = arith.constant 0 : i32
    %2 = arith.cmpi ne, %1, %c0_i32_0 : i32
    scf.if %2 {
      %cst_10 = arith.constant 0.000000e+00 : f32
      %12 = vector.broadcast %cst_10 : f32 to vector<128x128xf32>
      %c0_11 = arith.constant 0 : index
      %c0_12 = arith.constant 0 : index
      %13 = vector.load %arg7[%c0_11, %c0_12] : memref<128x128xf32, #tpu.memory_space<vmem>>, vector<128x128xf32>
      tpu.vector_store %arg7[%c0_11, %c0_12], %12 {strides = array<i32>} : memref<128x128xf32, #tpu.memory_space<vmem>>, vector<128x128xf32>,
    } else {
    }
    %c0 = arith.constant 0 : index
    %c0_1 = arith.constant 0 : index
    %3 = vector.load %arg7[%c0, %c0_1] : memref<128x128xf32, #tpu.memory_space<vmem>>, vector<128x128xf32>
    %c0_2 = arith.constant 0 : index
    %c0_3 = arith.constant 0 : index
    %4 = vector.load %arg2[%c0_2, %c0_3] : memref<128x128xbf16, #tpu.memory_space<vmem>>, vector<128x128xbf16>
    %c0_4 = arith.constant 0 : index
    %c0_5 = arith.constant 0 : index
    %5 = vector.load %arg3[%c0_4, %c0_5] : memref<128x128xbf16, #tpu.memory_space<vmem>>, vector<128x128xbf16>
    %cst = arith.constant dense<0.000000e+00> : vector<128x128xf32>
    %6 = tpu.matmul %4, %5, %cst {dimension_numbers = #tpu.dot_dimension_numbers<[1], [0], [0], [1], [0, 0, 1, 1], [], []>} : vector<128x128xbf16>, vector<128x128xbf16>, vector<128x128xf32> -> vector<128x128xf32>
    %7 = arith.addf %3, %6 : vector<128x128xf32>
    %c0_6 = arith.constant 0 : index
    %c0_7 = arith.constant 0 : index
    %8 = vector.load %arg7[%c0_6, %c0_7] : memref<128x128xf32, #tpu.memory_space<vmem>>, vector<128x128xf32>
    tpu.vector_store %arg7[%c0_6, %c0_7], %7 {strides = array<i32>} : memref<128x128xf32, #tpu.memory_space<vmem>>, vector<128x128xf32>,
    %c0_i32_8 = arith.constant 0 : i32
    %9 = arith.cmpi eq, %arg1, %c0_i32_8 : i32
    %10 = arith.extui %9 : i1 to i32
    %c0_i32_9 = arith.constant 0 : i32
    %11 = arith.cmpi ne, %10, %c0_i32_9 : i32
    scf.if %11 {
      %c0_10 = arith.constant 0 : index
      %c0_11 = arith.constant 0 : index
      %12 = vector.load %arg7[%c0_10, %c0_11] : memref<128x128xf32, #tpu.memory_space<vmem>>, vector<128x128xf32>
      %13 = arith.truncf %12 : vector<128x128xf32> to vector<128x128xbf16>
      %c0_12 = arith.constant 0 : index
      %c0_13 = arith.constant 0 : index
      %14 = vector.load %arg4[%c0_12, %c0_13] : memref<128x128xbf16, #tpu.memory_space<vmem>>, vector<128x128xbf16>
      tpu.vector_store %arg4[%c0_12, %c0_13], %13 {strides = array<i32>} : memref<128x128xbf16, #tpu.memory_space<vmem>>, vector<128x128xbf16>,
      %cst_14 = arith.constant dense<0.000000e+00> : vector<128xf32>
      %15 = vector.multi_reduction <add>, %12, %cst_14 [0] : vector<128x128xf32> to vector<128xf32>
      %16 = vector.shape_cast %15 : vector<128xf32> to vector<1x128xf32>
      %17 = vector.shape_cast %16 : vector<1x128xf32> to vector<1x1x128xf32>
      %c0_15 = arith.constant 0 : index
      %c0_16 = arith.constant 0 : index
      %c0_17 = arith.constant 0 : index
      %18 = vector.load %arg5[%c0_15, %c0_16, %c0_17] : memref<1x1x128xf32, #tpu.memory_space<vmem>>, vector<1x1x128xf32>
      tpu.vector_store %arg5[%c0_15, %c0_16, %c0_17], %17 {strides = array<i32>} : memref<1x1x128xf32, #tpu.memory_space<vmem>>, vector<1x1x128xf32>,
      %19 = arith.mulf %12, %12 : vector<128x128xf32>
      %cst_18 = arith.constant dense<0.000000e+00> : vector<128xf32>
      %20 = vector.multi_reduction <add>, %19, %cst_18 [0] : vector<128x128xf32> to vector<128xf32>
      %21 = vector.shape_cast %20 : vector<128xf32> to vector<1x128xf32>
      %22 = vector.shape_cast %21 : vector<1x128xf32> to vector<1x1x128xf32>
      %c0_19 = arith.constant 0 : index
      %c0_20 = arith.constant 0 : index
      %c0_21 = arith.constant 0 : index
      %23 = vector.load %arg6[%c0_19, %c0_20, %c0_21] : memref<1x1x128xf32, #tpu.memory_space<vmem>>, vector<1x1x128xf32>
      tpu.vector_store %arg6[%c0_19, %c0_20, %c0_21], %22 {strides = array<i32>} : memref<1x1x128xf32, #tpu.memory_space<vmem>>, vector<1x1x128xf32>,
    } else {
    }
    return
  }
  func.func @transform_0(%arg0: i32, %arg1: i32) -> (i32, i32) {
    %c0_i32 = arith.constant 0 : i32
    return %arg0, %arg1 : i32, i32
  }
  func.func @transform_1(%arg0: i32, %arg1: i32) -> (i32, i32) {
    %c0_i32 = arith.constant 0 : i32
    %c0_i32_0 = arith.constant 0 : i32
    return %arg1, %c0_i32 : i32, i32
  }
  func.func @transform_2(%arg0: i32, %arg1: i32) -> (i32, i32) {
    %c0_i32 = arith.constant 0 : i32
    %c0_i32_0 = arith.constant 0 : i32
    return %arg0, %c0_i32 : i32, i32
  }
  func.func @transform_3(%arg0: i32, %arg1: i32) -> (i32, i32, i32) {
    %c0_i32 = arith.constant 0 : i32
    %c0_i32_0 = arith.constant 0 : i32
    %c0_i32_1 = arith.constant 0 : i32
    return %arg0, %c0_i32, %c0_i32_0 : i32, i32, i32
  }
  func.func @transform_4(%arg0: i32, %arg1: i32) -> (i32, i32, i32) {
    %c0_i32 = arith.constant 0 : i32
    %c0_i32_0 = arith.constant 0 : i32
    %c0_i32_1 = arith.constant 0 : i32
    return %arg0, %c0_i32, %c0_i32_0 : i32, i32, i32
  }
}

</mosaic_0001>

<bundles_post_ra>
// kernel: basic_block_forward.5
= control target key start
LH: loop header
LB: loop body
LE: loop exit
PB: predicated region body
PF: predicated region fallthrough
CT: control target
= control target key end

     0   :  { %s422_s0 = inlined_call_operand.vmem [shape: bf16[128,128], index: 0, kind: input, shape index: {}]   ;;  %s423_s1 = inlined_call_operand.vmem [shape: f32[1,128], index: 1, kind: input, shape index: {}]   ;;  %s424_s2 = inlined_call_operand.vmem [shape: f32[1,128], index: 2, kind: input, shape index: {}]   ;;  %s425_s3 = inlined_call_operand.vmem [shape: bf16[128,128], index: 3, kind: output, shape index: {}]  }
   0x1   :  { %v227_v0 = vld [vmem:[%s422_s0] sm:$0xff]   ;;  %v298_v4 = vld [vmem:[%s422_s0 + $0x8] sm:$0xff]   ;;  %v299_v5 = vld [vmem:[%s422_s0 + $0x10] sm:$0xff]  }
   0x2   :  { %v338_v1 = vld [vmem:[%s423_s1] ss:$0 sm:$0xff]  ;;  %v228_v2 = vunpack.c.l.bf16 %v227_v0  ;;  %v229_v3 = vunpack.c.h.bf16 %v227_v0  ;;  %v300_v6 = vld [vmem:[%s422_s0 + $0x18] sm:$0xff]   ;;  %v232_v8 = vunpack.c.l.bf16 %v298_v4  ;;  %v233_v9 = vunpack.c.h.bf16 %v298_v4  ;;  %v302_v33 = vld [vmem:[%s422_s0 + $0x28] sm:$0xff]  }
   0x3   :  { %v352_v7 = vld [vmem:[%s424_s2] ss:$0 sm:$0xff]  ;;  %v236_v10 = vunpack.c.l.bf16 %v299_v5  ;;  %v237_v11 = vunpack.c.h.bf16 %v299_v5  ;;  %v240_v14 = vunpack.c.l.bf16 %v300_v6  ;;  %v241_v15 = vunpack.c.h.bf16 %v300_v6  ;;  %v303_v38 = vld [vmem:[%s422_s0 + $0x30] sm:$0xff]   ;;  %v304_v43 = vld [vmem:[%s422_s0 + $0x38] sm:$0xff]  }
   0x4   :  { %v53_v12 = vmul.f32 %v228_v2, %v338_v1  ;;  %v54_v13 = vmul.f32 %v229_v3, %v338_v1  ;;  %v55_v16 = vmul.f32 %v232_v8, %v338_v1  ;;  %v56_v17 = vmul.f32 %v233_v9, %v338_v1  ;;  %v301_v28 = vld [vmem:[%s422_s0 + $0x20] sm:$0xff]  }
   0x5   :  { %v57_v18 = vmul.f32 %v236_v10, %v338_v1  ;;  %v58_v19 = vmul.f32 %v237_v11, %v338_v1  ;;  %v59_v22 = vmul.f32 %v240_v14, %v338_v1  ;;  %v60_v23 = vmul.f32 %v241_v15, %v338_v1 }
   0x6   :  { %v76_v20 = vadd.f32 %v352_v7, %v53_v12  ;;  %v77_v21 = vadd.f32 %v352_v7, %v54_v13  ;;  %v78_v24 = vadd.f32 %v352_v7, %v55_v16  ;;  %v79_v25 = vadd.f32 %v352_v7, %v56_v17 }
   0x7   :  { %v80_v26 = vadd.f32 %v352_v7, %v57_v18  ;;  %v81_v27 = vadd.f32 %v352_v7, %v58_v19  ;;  %v82_v31 = vadd.f32 %v352_v7, %v59_v22  ;;  %v83_v32 = vadd.f32 %v352_v7, %v60_v23 }
   0x8   :  { %v92_v29 = vmax.f32 %v76_v20, 0.0  ;;  %v93_v30 = vmax.f32 %v77_v21, 0.0  ;;  %v94_v34 = vmax.f32 %v78_v24, 0.0  ;;  %v95_v35 = vmax.f32 %v79_v25, 0.0 }
   0x9   :  { %v96_v36 = vmax.f32 %v80_v26, 0.0  ;;  %v97_v37 = vmax.f32 %v81_v27, 0.0  ;;  %v98_v40 = vmax.f32 %v82_v31, 0.0  ;;  %v99_v41 = vmax.f32 %v83_v32, 0.0 }
   0xa   :  { %v261_v39 = vpack.c.bf16 %v93_v30, %v92_v29  ;;  %v244_v42 = vunpack.c.l.bf16 %v301_v28  ;;  %v266_v44 = vpack.c.bf16 %v95_v35, %v94_v34  ;;  %v245_v46 = vunpack.c.h.bf16 %v301_v28 }
   0xb   :  { %v271_v45 = vpack.c.bf16 %v97_v37, %v96_v36  ;;  %v248_v47 = vunpack.c.l.bf16 %v302_v33  ;;  %v276_v48 = vpack.c.bf16 %v99_v41, %v98_v40  ;;  %v249_v50 = vunpack.c.h.bf16 %v302_v33 }
   0xc   :  { %262 = vst [vmem:[%s425_s3] sm:$0xff] %v261_v39   ;;  %v61_v49 = vmul.f32 %v244_v42, %v338_v1  ;;  %v252_v51 = vunpack.c.l.bf16 %v303_v38  ;;  %305 = vst [vmem:[%s425_s3 + $0x8] sm:$0xff] %v266_v44   ;;  %v62_v52 = vmul.f32 %v245_v46, %v338_v1  ;;  %v253_v54 = vunpack.c.h.bf16 %v303_v38 }
   0xd   :  { %306 = vst [vmem:[%s425_s3 + $0x10] sm:$0xff] %v271_v45   ;;  %v63_v53 = vmul.f32 %v248_v47, %v338_v1  ;;  %v256_v55 = vunpack.c.l.bf16 %v304_v43  ;;  %307 = vst [vmem:[%s425_s3 + $0x18] sm:$0xff] %v276_v48   ;;  %v64_v57 = vmul.f32 %v249_v50, %v338_v1  ;;  %v257_v59 = vunpack.c.h.bf16 %v304_v43 }
   0xe   :  { %v84_v56 = vadd.f32 %v352_v7, %v61_v49  ;;  %v65_v58 = vmul.f32 %v252_v51, %v338_v1  ;;  %v85_v60 = vadd.f32 %v352_v7, %v62_v52  ;;  %v66_v62 = vmul.f32 %v253_v54, %v338_v1 }
   0xf   :  { %v86_v61 = vadd.f32 %v352_v7, %v63_v53  ;;  %v67_v63 = vmul.f32 %v256_v55, %v338_v1  ;;  %v87_v2 = vadd.f32 %v352_v7, %v64_v57  ;;  %v68_v4 = vmul.f32 %v257_v59, %v338_v1 }
  0x10   :  { %v100_v0 = vmax.f32 %v84_v56, 0.0  ;;  %v88_v3 = vadd.f32 %v352_v7, %v65_v58  ;;  %v101_v5 = vmax.f32 %v85_v60, 0.0  ;;  %v89_v8 = vadd.f32 %v352_v7, %v66_v62 }
  0x11   :  { %v102_v6 = vmax.f32 %v86_v61, 0.0  ;;  %v90_v9 = vadd.f32 %v352_v7, %v67_v63  ;;  %v103_v10 = vmax.f32 %v87_v2, 0.0  ;;  %v91_v12 = vadd.f32 %v352_v7, %v68_v4 }
  0x12   :  { %v104_v11 = vmax.f32 %v88_v3, 0.0  ;;  %v281_v13 = vpack.c.bf16 %v101_v5, %v100_v0  ;;  %v105_v14 = vmax.f32 %v89_v8, 0.0 }
  0x13   :  { %v106_v15 = vmax.f32 %v90_v9, 0.0  ;;  %v286_v16 = vpack.c.bf16 %v103_v10, %v102_v6  ;;  %v107_v17 = vmax.f32 %v91_v12, 0.0 }
  0x14   :  { %308 = vst [vmem:[%s425_s3 + $0x20] sm:$0xff] %v281_v13   ;;  %v291_v1 = vpack.c.bf16 %v105_v14, %v104_v11 }
  0x15   :  { %309 = vst [vmem:[%s425_s3 + $0x28] sm:$0xff] %v286_v16   ;;  %v296_v18 = vpack.c.bf16 %v107_v17, %v106_v15 }
  0x16   :  { %310 = vst [vmem:[%s425_s3 + $0x30] sm:$0xff] %v291_v1  }
  0x17   :  { %311 = vst [vmem:[%s425_s3 + $0x38] sm:$0xff] %v296_v18  }

// kernel: basic_block_forward.4
= control target key start
LH: loop header
LB: loop body
LE: loop exit
PB: predicated region body
PF: predicated region fallthrough
CT: control target
= control target key end

     0   :  { %s1389_s1 = inlined_call_operand.vmem [shape: bf16[128,128], index: 1, kind: input, shape index: {}]   ;;  %s1390_s3 = inlined_call_operand.vmem [shape: bf16[128,128], index: 3, kind: input, shape index: {}]   ;;  %s1391_s0 = inlined_call_operand.vmem [shape: bf16[128,128], index: 0, kind: input, shape index: {}]   ;;  %s1392_s2 = inlined_call_operand.vmem [shape: bf16[128,128], index: 2, kind: input, shape index: {}]   ;;  %s1393_s4 = inlined_call_operand.vmem [shape: bf16[128,128], index: 4, kind: output, shape index: {0}]   ;;  %s1394_s7 = inlined_call_operand.vmem [shape: bf16[128,128], index: 7, kind: output, shape index: {3}]   ;;  %s1395_s5 = inlined_call_operand.vmem [shape: f32[1,1,128], index: 5, kind: output, shape index: {1}]   ;;  %s1396_s8 = inlined_call_operand.vmem [shape: f32[1,1,128], index: 8, kind: output, shape index: {4}]   ;;  %s1397_s6 = inlined_call_operand.vmem [shape: f32[1,1,128], index: 6, kind: output, shape index: {2}]   ;;  %s1398_s9 = inlined_call_operand.vmem [shape: f32[1,1,128], index: 9, kind: output, shape index: {5}]  }
   0x1   :  { %v1151_v0 = vld [vmem:[%s1389_s1 + $0x38] sm:$0xff]   ;;  %v1153_v2 = vld [vmem:[%s1389_s1 + $0x30] sm:$0xff]   ;;  %v1155_v4 = vld [vmem:[%s1389_s1 + $0x28] sm:$0xff]  }
   0x2   :  { %v1152_v1 = vld [vmem:[%s1390_s3 + $0x38] sm:$0xff]   ;;  %1087 = vmatprep.subr.bf16.mxu0 %v1151_v0  ;;  %v1154_v3 = vld [vmem:[%s1390_s3 + $0x30] sm:$0xff]   ;;  %v1156_v5 = vld [vmem:[%s1390_s3 + $0x28] sm:$0xff]  }
   0x3   :  { %1119 = vmatprep.subr.bf16.mxu1 %v1152_v1  ;;  %1088 = vmatpush3.bf16.msra.mxu0 %v1151_v0  ;;  %v1157_v6 = vld [vmem:[%s1389_s1 + $0x20] sm:$0xff]   ;;  %v1159_v8 = vld [vmem:[%s1389_s1 + $0x18] sm:$0xff]   ;;  %v1161_v10 = vld [vmem:[%s1389_s1 + $0x10] sm:$0xff]  }
   0x4   :  { %1120 = vmatpush3.bf16.msra.mxu1 %v1152_v1  ;;  %1089 = vmatprep.subr.bf16.mxu0 %v1153_v2  ;;  %v1158_v7 = vld [vmem:[%s1390_s3 + $0x20] sm:$0xff]   ;;  %v1160_v9 = vld [vmem:[%s1390_s3 + $0x18] sm:$0xff]   ;;  %v1162_v11 = vld [vmem:[%s1390_s3 + $0x10] sm:$0xff]  }
   0x5   :  { %1121 = vmatprep.subr.bf16.mxu1 %v1154_v3  ;;  %v1167_v12 = vld [vmem:[%s1391_s0] sm:$0xff]   ;;  %v1163_v14 = vld [vmem:[%s1389_s1 + $0x8] sm:$0xff]   ;;  %v1171_v20 = vld [vmem:[%s1391_s0 + $0x10] sm:$0xff]  }
   0x6   :  { %v1168_v13 = vld [vmem:[%s1392_s2] sm:$0xff]   ;;  %1103 = vmatprep.mubr.bf16.mxu0 %v1167_v12  ;;  %v1164_v15 = vld [vmem:[%s1390_s3 + $0x8] sm:$0xff]   ;;  %v1172_v21 = vld [vmem:[%s1392_s2 + $0x10] sm:$0xff]  }
   0x7   :  { %1090 = vmatpush3.bf16.msra.mxu0 %v1153_v2  ;;  %1135 = vmatprep.mubr.bf16.mxu1 %v1168_v13  ;;  %v1165_v16 = vld [vmem:[%s1389_s1] sm:$0xff]   ;;  %v1169_v18 = vld [vmem:[%s1391_s0 + $0x8] sm:$0xff]   ;;  %v1173_v22 = vld [vmem:[%s1391_s0 + $0x18] sm:$0xff]  }
   0x8   :  { %1122 = vmatpush3.bf16.msra.mxu1 %v1154_v3  ;;  %1091 = vmatprep.subr.bf16.mxu0 %v1155_v4  ;;  %v1166_v17 = vld [vmem:[%s1390_s3] sm:$0xff]   ;;  %v1170_v19 = vld [vmem:[%s1392_s2 + $0x8] sm:$0xff]   ;;  %v1174_v23 = vld [vmem:[%s1392_s2 + $0x18] sm:$0xff]  }
   0x9   :  { %1123 = vmatprep.subr.bf16.mxu1 %v1156_v5  ;;  %v1175_v24 = vld [vmem:[%s1391_s0 + $0x20] sm:$0xff]   ;;  %v1177_v26 = vld [vmem:[%s1391_s0 + $0x28] sm:$0xff]   ;;  %v1179_v28 = vld [vmem:[%s1391_s0 + $0x30] sm:$0xff]  }
   0xa   :  { %v1176_v25 = vld [vmem:[%s1392_s2 + $0x20] sm:$0xff]   ;;  %v1178_v27 = vld [vmem:[%s1392_s2 + $0x28] sm:$0xff]   ;;  %v1180_v29 = vld [vmem:[%s1392_s2 + $0x30] sm:$0xff]  }
   0xb   :  { %1092 = vmatpush3.bf16.msra.mxu0 %v1155_v4  ;;  %v1181_v30 = vld [vmem:[%s1391_s0 + $0x38] sm:$0xff]  }
   0xc   :  { %1124 = vmatpush3.bf16.msra.mxu1 %v1156_v5  ;;  %1093 = vmatprep.subr.bf16.mxu0 %v1157_v6  ;;  %v1182_v31 = vld [vmem:[%s1392_s2 + $0x38] sm:$0xff]  }
   0xd   :  { %1125 = vmatprep.subr.bf16.mxu1 %v1158_v7 }
   0xf   :  { %1094 = vmatpush3.bf16.msra.mxu0 %v1157_v6 }
  0x10   :  { %1126 = vmatpush3.bf16.msra.mxu1 %v1158_v7  ;;  %1095 = vmatprep.subr.bf16.mxu0 %v1159_v8 }
  0x11   :  { %1127 = vmatprep.subr.bf16.mxu1 %v1160_v9 }
  0x13   :  { %1096 = vmatpush3.bf16.msra.mxu0 %v1159_v8 }
  0x14   :  { %1128 = vmatpush3.bf16.msra.mxu1 %v1160_v9  ;;  %1097 = vmatprep.subr.bf16.mxu0 %v1161_v10 }
  0x15   :  { %1129 = vmatprep.subr.bf16.mxu1 %v1162_v11 }
  0x17   :  { %1098 = vmatpush3.bf16.msra.mxu0 %v1161_v10 }
  0x18   :  { %1130 = vmatpush3.bf16.msra.mxu1 %v1162_v11  ;;  %1099 = vmatprep.subr.bf16.mxu0 %v1163_v14 }
  0x19   :  { %1131 = vmatprep.subr.bf16.mxu1 %v1164_v15 }
  0x1b   :  { %1100 = vmatpush3.bf16.msra.mxu0 %v1163_v14 }
  0x1c   :  { %1132 = vmatpush3.bf16.msra.mxu1 %v1164_v15  ;;  %1101 = vmatprep.subr.bf16.mxu0 %v1165_v16 }
  0x1d   :  { %1133 = vmatprep.subr.bf16.mxu1 %v1166_v17 }
  0x1f   :  { %1102 = vmatpush3.bf16.msra.mxu0 %v1165_v16 }
  0x20   :  { %1134 = vmatpush3.bf16.msra.mxu1 %v1166_v17 }
  0x22   :  { %1104 = vmatmul.mubr.bf16.vlgmr.msra.gmra.mxu0 %v1169_v18 }
  0x23   :  { %1136 = vmatmul.mubr.bf16.vlgmr.msra.gmra.mxu1 %v1170_v19  ;;  %1107 = vmatprep.mubr.bf16.mxu0 %v1171_v20 }
  0x24   :  { %1139 = vmatprep.mubr.bf16.mxu1 %v1172_v21 }
  0x2a   :  { %1108 = vmatmul.mubr.bf16.gmra.mxu0 %v1173_v22 }
  0x2b   :  { %1140 = vmatmul.mubr.bf16.gmra.mxu1 %v1174_v23  ;;  %1111 = vmatprep.mubr.bf16.mxu0 %v1175_v24 }
  0x2c   :  { %1143 = vmatprep.mubr.bf16.mxu1 %v1176_v25 }
  0x32   :  { %1112 = vmatmul.mubr.bf16.gmra.mxu0 %v1177_v26 }
  0x33   :  { %1144 = vmatmul.mubr.bf16.gmra.mxu1 %v1178_v27  ;;  %1115 = vmatprep.mubr.bf16.mxu0 %v1179_v28 }
  0x34   :  { %1147 = vmatprep.mubr.bf16.mxu1 %v1180_v29 }
  0x3a   :  { %1116 = vmatmul.mubr.bf16.gmra.mxu0 %v1181_v30 }
  0x3b   :  { %1148 = vmatmul.mubr.bf16.gmra.mxu1 %v1182_v31 }
  0xe2   :  { %v1105_v32 = vpop.f32.mrf.mxu0 }
  0xe3   :  { %v1137_v33 = vpop.f32.mrf.mxu1  ;;  %v440_v51 = vmul.f32 %v1105_v32, %v1105_v32 }
  0xe4   :  { %v222_v34 = vpop.f32.mrf.mxu0  ;;  %v805_v55 = vmul.f32 %v1137_v33, %v1137_v33 }
  0xe5   :  { %v638_v35 = vpop.f32.mrf.mxu1  ;;  %v438_v41 = vmul.f32 %v222_v34, %v222_v34 }
  0xe6   :  { %v1106_v36 = vpop.f32.mrf.mxu0  ;;  %v803_v46 = vmul.f32 %v638_v35, %v638_v35 }
  0xe7   :  { %v969_v37 = vpack.c.bf16 %v1106_v36, %v1105_v32  ;;  %v1138_v38 = vpop.f32.mrf.mxu1  ;;  %v441_v59 = vmul.f32 %v1106_v36, %v1106_v36 }
  0xe8   :  { %v1009_v39 = vpack.c.bf16 %v1138_v38, %v1137_v33  ;;  %v225_v40 = vpop.f32.mrf.mxu0  ;;  %v806_v63 = vmul.f32 %v1138_v38, %v1138_v38 }
  0xe9   :  { %1041 = vst [vmem:[%s1393_s4 + $0x8] sm:$0xff] %v969_v37   ;;  %v964_v42 = vpack.c.bf16 %v225_v40, %v222_v34  ;;  %v416_v43 = vadd.f32 %v225_v40, %v222_v34  ;;  %v439_v44 = vmul.f32 %v225_v40, %v225_v40  ;;  %v641_v45 = vpop.f32.mrf.mxu1 }
  0xea   :  { %1048 = vst [vmem:[%s1394_s7 + $0x8] sm:$0xff] %v1009_v39   ;;  %v1004_v47 = vpack.c.bf16 %v641_v45, %v638_v35  ;;  %v781_v48 = vadd.f32 %v641_v45, %v638_v35  ;;  %v804_v49 = vmul.f32 %v641_v45, %v641_v45  ;;  %v1109_v50 = vpop.f32.mrf.mxu0 }
  0xeb   :  { %965 = vst [vmem:[%s1393_s4] sm:$0xff] %v964_v42   ;;  %v417_v52 = vadd.f32 %v1105_v32, %v416_v43  ;;  %v454_v53 = vadd.f32 %v439_v44, %v438_v41  ;;  %v1141_v54 = vpop.f32.mrf.mxu1  ;;  %v444_v23 = vmul.f32 %v1109_v50, %v1109_v50 }
  0xec   :  { %1005 = vst [vmem:[%s1394_s7] sm:$0xff] %v1004_v47   ;;  %v782_v56 = vadd.f32 %v1137_v33, %v781_v48  ;;  %v819_v57 = vadd.f32 %v804_v49, %v803_v46  ;;  %v238_v58 = vpop.f32.mrf.mxu0  ;;  %v809_v27 = vmul.f32 %v1141_v54, %v1141_v54 }
  0xed   :  { %v455_v60 = vadd.f32 %v454_v53, %v440_v51  ;;  %v418_v61 = vadd.f32 %v1106_v36, %v417_v52  ;;  %v654_v62 = vpop.f32.mrf.mxu1  ;;  %v442_v4 = vmul.f32 %v238_v58, %v238_v58 }
  0xee   :  { %v820_v0 = vadd.f32 %v819_v57, %v805_v55  ;;  %v783_v1 = vadd.f32 %v1138_v38, %v782_v56  ;;  %v1110_v2 = vpop.f32.mrf.mxu0  ;;  %v807_v9 = vmul.f32 %v654_v62, %v654_v62 }
  0xef   :  { %v419_v3 = vadd.f32 %v418_v61, %v238_v58  ;;  %v456_v5 = vadd.f32 %v455_v60, %v441_v59  ;;  %v979_v6 = vpack.c.bf16 %v1110_v2, %v1109_v50  ;;  %v1142_v7 = vpop.f32.mrf.mxu1  ;;  %v445_v31 = vmul.f32 %v1110_v2, %v1110_v2 }
  0xf0   :  { %v784_v8 = vadd.f32 %v783_v1, %v654_v62  ;;  %v821_v10 = vadd.f32 %v820_v0, %v806_v63  ;;  %v1019_v11 = vpack.c.bf16 %v1142_v7, %v1141_v54  ;;  %v241_v12 = vpop.f32.mrf.mxu0  ;;  %v810_v35 = vmul.f32 %v1142_v7, %v1142_v7 }
  0xf1   :  { %v457_v13 = vadd.f32 %v456_v5, %v442_v4  ;;  %1043 = vst [vmem:[%s1393_s4 + $0x18] sm:$0xff] %v979_v6   ;;  %v974_v14 = vpack.c.bf16 %v241_v12, %v238_v58  ;;  %v420_v15 = vadd.f32 %v419_v3, %v241_v12  ;;  %v443_v16 = vmul.f32 %v241_v12, %v241_v12  ;;  %v657_v17 = vpop.f32.mrf.mxu1 }
  0xf2   :  { %v822_v18 = vadd.f32 %v821_v10, %v807_v9  ;;  %1050 = vst [vmem:[%s1394_s7 + $0x18] sm:$0xff] %v1019_v11   ;;  %v1014_v19 = vpack.c.bf16 %v657_v17, %v654_v62  ;;  %v785_v20 = vadd.f32 %v784_v8, %v657_v17  ;;  %v808_v21 = vmul.f32 %v657_v17, %v657_v17  ;;  %v1113_v22 = vpop.f32.mrf.mxu0 }
  0xf3   :  { %1042 = vst [vmem:[%s1393_s4 + $0x10] sm:$0xff] %v974_v14   ;;  %v421_v24 = vadd.f32 %v1109_v50, %v420_v15  ;;  %v458_v25 = vadd.f32 %v457_v13, %v443_v16  ;;  %v1145_v26 = vpop.f32.mrf.mxu1  ;;  %v448_v59 = vmul.f32 %v1113_v22, %v1113_v22 }
  0xf4   :  { %1049 = vst [vmem:[%s1394_s7 + $0x10] sm:$0xff] %v1014_v19   ;;  %v786_v28 = vadd.f32 %v1141_v54, %v785_v20  ;;  %v823_v29 = vadd.f32 %v822_v18, %v808_v21  ;;  %v254_v30 = vpop.f32.mrf.mxu0  ;;  %v813_v63 = vmul.f32 %v1145_v26, %v1145_v26 }
  0xf5   :  { %v459_v32 = vadd.f32 %v458_v25, %v444_v23  ;;  %v422_v33 = vadd.f32 %v1110_v2, %v421_v24  ;;  %v670_v34 = vpop.f32.mrf.mxu1  ;;  %v446_v40 = vmul.f32 %v254_v30, %v254_v30 }
  0xf6   :  { %v824_v36 = vadd.f32 %v823_v29, %v809_v27  ;;  %v787_v37 = vadd.f32 %v1142_v7, %v786_v28  ;;  %v1114_v38 = vpop.f32.mrf.mxu0  ;;  %v811_v45 = vmul.f32 %v670_v34, %v670_v34 }
  0xf7   :  { %v423_v39 = vadd.f32 %v422_v33, %v254_v30  ;;  %v460_v41 = vadd.f32 %v459_v32, %v445_v31  ;;  %v989_v42 = vpack.c.bf16 %v1114_v38, %v1113_v22  ;;  %v1146_v43 = vpop.f32.mrf.mxu1  ;;  %v449_v3 = vmul.f32 %v1114_v38, %v1114_v38 }
  0xf8   :  { %v788_v44 = vadd.f32 %v787_v37, %v670_v34  ;;  %v825_v46 = vadd.f32 %v824_v36, %v810_v35  ;;  %v1029_v47 = vpack.c.bf16 %v1146_v43, %v1145_v26  ;;  %v257_v48 = vpop.f32.mrf.mxu0  ;;  %v814_v7 = vmul.f32 %v1146_v43, %v1146_v43 }
  0xf9   :  { %v461_v49 = vadd.f32 %v460_v41, %v446_v40  ;;  %1045 = vst [vmem:[%s1393_s4 + $0x28] sm:$0xff] %v989_v42   ;;  %v984_v50 = vpack.c.bf16 %v257_v48, %v254_v30  ;;  %v424_v51 = vadd.f32 %v423_v39, %v257_v48  ;;  %v447_v52 = vmul.f32 %v257_v48, %v257_v48  ;;  %v673_v53 = vpop.f32.mrf.mxu1 }
  0xfa   :  { %v826_v54 = vadd.f32 %v825_v46, %v811_v45  ;;  %1052 = vst [vmem:[%s1394_s7 + $0x28] sm:$0xff] %v1029_v47   ;;  %v1024_v55 = vpack.c.bf16 %v673_v53, %v670_v34  ;;  %v789_v56 = vadd.f32 %v788_v44, %v673_v53  ;;  %v812_v57 = vmul.f32 %v673_v53, %v673_v53  ;;  %v1117_v58 = vpop.f32.mrf.mxu0 }
  0xfb   :  { %1044 = vst [vmem:[%s1393_s4 + $0x20] sm:$0xff] %v984_v50   ;;  %v425_v60 = vadd.f32 %v1113_v22, %v424_v51  ;;  %v462_v61 = vadd.f32 %v461_v49, %v447_v52  ;;  %v1149_v62 = vpop.f32.mrf.mxu1  ;;  %v452_v30 = vmul.f32 %v1117_v58, %v1117_v58 }
  0xfc   :  { %1051 = vst [vmem:[%s1394_s7 + $0x20] sm:$0xff] %v1024_v55   ;;  %v790_v0 = vadd.f32 %v1145_v26, %v789_v56  ;;  %v827_v1 = vadd.f32 %v826_v54, %v812_v57  ;;  %v270_v2 = vpop.f32.mrf.mxu0  ;;  %v817_v33 = vmul.f32 %v1149_v62, %v1149_v62 }
  0xfd   :  { %v463_v4 = vadd.f32 %v462_v61, %v448_v59  ;;  %v426_v5 = vadd.f32 %v1114_v38, %v425_v60  ;;  %v686_v6 = vpop.f32.mrf.mxu1  ;;  %v450_v12 = vmul.f32 %v270_v2, %v270_v2 }
  0xfe   :  { %v828_v8 = vadd.f32 %v827_v1, %v813_v63  ;;  %v791_v9 = vadd.f32 %v1146_v43, %v790_v0  ;;  %v1118_v10 = vpop.f32.mrf.mxu0  ;;  %v815_v17 = vmul.f32 %v686_v6, %v686_v6 }
  0xff   :  { %v427_v11 = vadd.f32 %v426_v5, %v270_v2  ;;  %v464_v13 = vadd.f32 %v463_v4, %v449_v3  ;;  %v999_v14 = vpack.c.bf16 %v1118_v10, %v1117_v58  ;;  %v1150_v15 = vpop.f32.mrf.mxu1  ;;  %v453_v36 = vmul.f32 %v1118_v10, %v1118_v10 }
 0x100   :  { %v792_v16 = vadd.f32 %v791_v9, %v686_v6  ;;  %v829_v18 = vadd.f32 %v828_v8, %v814_v7  ;;  %v1039_v19 = vpack.c.bf16 %v1150_v15, %v1149_v62  ;;  %v273_v20 = vpop.f32.mrf.mxu0  ;;  %v818_v39 = vmul.f32 %v1150_v15, %v1150_v15 }
 0x101   :  { %v465_v21 = vadd.f32 %v464_v13, %v450_v12  ;;  %1047 = vst [vmem:[%s1393_s4 + $0x38] sm:$0xff] %v999_v14   ;;  %v994_v22 = vpack.c.bf16 %v273_v20, %v270_v2  ;;  %v428_v23 = vadd.f32 %v427_v11, %v273_v20  ;;  %v451_v24 = vmul.f32 %v273_v20, %v273_v20  ;;  %v689_v25 = vpop.f32.mrf.mxu1 }
 0x102   :  { %v830_v26 = vadd.f32 %v829_v18, %v815_v17  ;;  %1054 = vst [vmem:[%s1394_s7 + $0x38] sm:$0xff] %v1039_v19   ;;  %v1034_v27 = vpack.c.bf16 %v689_v25, %v686_v6  ;;  %v793_v28 = vadd.f32 %v792_v16, %v689_v25  ;;  %v816_v29 = vmul.f32 %v689_v25, %v689_v25 }
 0x103   :  { %1046 = vst [vmem:[%s1393_s4 + $0x30] sm:$0xff] %v994_v22   ;;  %v429_v31 = vadd.f32 %v1117_v58, %v428_v23  ;;  %v466_v32 = vadd.f32 %v465_v21, %v451_v24 }
 0x104   :  { %1053 = vst [vmem:[%s1394_s7 + $0x30] sm:$0xff] %v1034_v27   ;;  %v794_v34 = vadd.f32 %v1149_v62, %v793_v28  ;;  %v831_v35 = vadd.f32 %v830_v26, %v816_v29 }
 0x105   :  { %v430_v37 = vadd.f32 %v1118_v10, %v429_v31  ;;  %v467_v38 = vadd.f32 %v466_v32, %v452_v30 }
 0x106   :  { %v795_v40 = vadd.f32 %v1150_v15, %v794_v34  ;;  %v832_v41 = vadd.f32 %v831_v35, %v817_v33 }
 0x107   :  { %v431_v42 = vrot.slane %v430_v37, 4  ;;  %v468_v43 = vadd.f32 %v467_v38, %v453_v36 }
 0x108   :  { %v796_v44 = vrot.slane %v795_v40, 4  ;;  %v833_v45 = vadd.f32 %v832_v41, %v818_v39 }
 0x109   :  { %v432_v46 = vadd.f32 %v431_v42, %v430_v37  ;;  %v469_v47 = vrot.slane %v468_v43, 4 }
 0x10a   :  { %v797_v48 = vadd.f32 %v796_v44, %v795_v40  ;;  %v834_v49 = vrot.slane %v833_v45, 4 }
 0x10b   :  { %v433_v50 = vrot.slane %v432_v46, 2  ;;  %v470_v51 = vadd.f32 %v469_v47, %v468_v43 }
 0x10c   :  { %v798_v52 = vrot.slane %v797_v48, 2  ;;  %v835_v53 = vadd.f32 %v834_v49, %v833_v45 }
 0x10d   :  { %v434_v54 = vadd.f32 %v433_v50, %v432_v46  ;;  %v471_v55 = vrot.slane %v470_v51, 2 }
 0x10e   :  { %v799_v56 = vadd.f32 %v798_v52, %v797_v48  ;;  %v836_v57 = vrot.slane %v835_v53, 2 }
 0x10f   :  { %v435_v58 = vrot.slane %v434_v54, 1  ;;  %v472_v59 = vadd.f32 %v471_v55, %v470_v51 }
 0x110   :  { %v800_v60 = vrot.slane %v799_v56, 1  ;;  %v837_v61 = vadd.f32 %v836_v57, %v835_v53 }
 0x111   :  { %v436_v62 = vadd.f32 %v435_v58, %v434_v54  ;;  %v473_v63 = vrot.slane %v472_v59, 1 }
 0x112   :  { %v801_v0 = vadd.f32 %v800_v60, %v799_v56  ;;  %v838_v1 = vrot.slane %v837_v61, 1 }
 0x113   :  { %437 = vst [vmem:[%s1395_s5] sm:$0x1] %v436_v62  ;;  %v474_v2 = vadd.f32 %v473_v63, %v472_v59 }
 0x114   :  { %802 = vst [vmem:[%s1396_s8] sm:$0x1] %v801_v0  ;;  %v839_v3 = vadd.f32 %v838_v1, %v837_v61 }
 0x115   :  { %475 = vst [vmem:[%s1397_s6] sm:$0x1] %v474_v2 }
 0x116   :  { %840 = vst [vmem:[%s1398_s9] sm:$0x1] %v839_v3 }

// kernel: basic_block_forward.7
= control target key start
LH: loop header
LB: loop body
LE: loop exit
PB: predicated region body
PF: predicated region fallthrough
CT: control target
= control target key end

     0   :  { %s528_s0 = inlined_call_operand.vmem [shape: bf16[128,128], index: 0, kind: input, shape index: {}]   ;;  %s529_s1 = inlined_call_operand.vmem [shape: f32[1,128], index: 1, kind: input, shape index: {}]   ;;  %s530_s2 = inlined_call_operand.vmem [shape: f32[1,128], index: 2, kind: input, shape index: {}]   ;;  %s531_s3 = inlined_call_operand.vmem [shape: bf16[128,128], index: 3, kind: input, shape index: {}]   ;;  %s532_s4 = inlined_call_operand.vmem [shape: f32[1,128], index: 4, kind: input, shape index: {}]   ;;  %s533_s5 = inlined_call_operand.vmem [shape: f32[1,128], index: 5, kind: input, shape index: {}]   ;;  %s534_s6 = inlined_call_operand.vmem [shape: f32[128,128], index: 6, kind: output, shape index: {}]  }
   0x1   :  { %v236_v0 = vld [vmem:[%s528_s0] sm:$0xff]   ;;  %v299_v9 = vld [vmem:[%s528_s0 + $0x8] sm:$0xff]   ;;  %v300_v20 = vld [vmem:[%s528_s0 + $0x10] sm:$0xff]  }
   0x2   :  { %v354_v1 = vld [vmem:[%s529_s1] ss:$0 sm:$0xff]  ;;  %v237_v2 = vunpack.c.l.bf16 %v236_v0  ;;  %v238_v5 = vunpack.c.h.bf16 %v236_v0  ;;  %v306_v10 = vld [vmem:[%s531_s3 + $0x8] sm:$0xff]   ;;  %v241_v14 = vunpack.c.l.bf16 %v299_v9  ;;  %v242_v18 = vunpack.c.h.bf16 %v299_v9  ;;  %v307_v21 = vld [vmem:[%s531_s3 + $0x10] sm:$0xff]  }
   0x3   :  { %v268_v3 = vld [vmem:[%s531_s3] sm:$0xff]   ;;  %v273_v15 = vunpack.c.l.bf16 %v306_v10  ;;  %v274_v19 = vunpack.c.h.bf16 %v306_v10  ;;  %v245_v32 = vunpack.c.l.bf16 %v300_v20  ;;  %v277_v33 = vunpack.c.l.bf16 %v307_v21  ;;  %v301_v42 = vld [vmem:[%s528_s0 + $0x18] sm:$0xff]  }
   0x4   :  { %v362_v4 = vld [vmem:[%s532_s4] ss:$0 sm:$0xff]  ;;  %v269_v7 = vunpack.c.l.bf16 %v268_v3  ;;  %v270_v8 = vunpack.c.h.bf16 %v268_v3  ;;  %v62_v11 = vmul.f32 %v237_v2, %v354_v1  ;;  %v63_v13 = vmul.f32 %v238_v5, %v354_v1  ;;  %v308_v43 = vld [vmem:[%s531_s3 + $0x18] sm:$0xff]  }
   0x5   :  { %v367_v6 = vld [vmem:[%s530_s2] ss:$0 sm:$0xff]  ;;  %v64_v24 = vmul.f32 %v241_v14, %v354_v1  ;;  %v142_v25 = vmul.f32 %v273_v15, %v362_v4  ;;  %v65_v28 = vmul.f32 %v242_v18, %v354_v1  ;;  %v143_v29 = vmul.f32 %v274_v19, %v362_v4  ;;  %v303_v14 = vld [vmem:[%s528_s0 + $0x28] sm:$0xff]  }
   0x6   :  { %v379_v12 = vld [vmem:[%s533_s5] ss:$0 sm:$0xff]  ;;  %v140_v16 = vmul.f32 %v269_v7, %v362_v4  ;;  %v141_v17 = vmul.f32 %v270_v8, %v362_v4  ;;  %v85_v22 = vadd.f32 %v367_v6, %v62_v11  ;;  %v86_v23 = vadd.f32 %v367_v6, %v63_v13  ;;  %v310_v19 = vld [vmem:[%s531_s3 + $0x28] sm:$0xff]  }
   0x7   :  { %v87_v30 = vadd.f32 %v367_v6, %v64_v24  ;;  %v165_v31 = vadd.f32 %v379_v12, %v142_v25  ;;  %v88_v36 = vadd.f32 %v367_v6, %v65_v28  ;;  %v166_v37 = vadd.f32 %v379_v12, %v143_v29  ;;  %v302_v52 = vld [vmem:[%s528_s0 + $0x20] sm:$0xff]  }
   0x8   :  { %v163_v26 = vadd.f32 %v379_v12, %v140_v16  ;;  %v164_v27 = vadd.f32 %v379_v12, %v141_v17  ;;  %v66_v39 = vmul.f32 %v245_v32, %v354_v1  ;;  %v144_v40 = vmul.f32 %v277_v33, %v362_v4  ;;  %v309_v57 = vld [vmem:[%s531_s3 + $0x20] sm:$0xff]   ;;  %v304_v32 = vld [vmem:[%s528_s0 + $0x30] sm:$0xff]  }
   0x9   :  { %v181_v38 = vadd.f32 %v165_v31, %v87_v30  ;;  %v246_v41 = vunpack.c.h.bf16 %v300_v20  ;;  %v182_v46 = vadd.f32 %v166_v37, %v88_v36  ;;  %v278_v47 = vunpack.c.h.bf16 %v307_v21  ;;  %v311_v33 = vld [vmem:[%s531_s3 + $0x30] sm:$0xff]  }
   0xa   :  { %v179_v34 = vadd.f32 %v163_v26, %v85_v22  ;;  %v180_v35 = vadd.f32 %v164_v27, %v86_v23  ;;  %v89_v49 = vadd.f32 %v367_v6, %v66_v39  ;;  %v167_v50 = vadd.f32 %v379_v12, %v144_v40 }
   0xb   :  { %v197_v48 = vmax.f32 %v181_v38, 0.0  ;;  %v67_v51 = vmul.f32 %v246_v41, %v354_v1  ;;  %v198_v53 = vmax.f32 %v182_v46, 0.0  ;;  %v145_v54 = vmul.f32 %v278_v47, %v362_v4  ;;  %v305_v46 = vld [vmem:[%s528_s0 + $0x38] sm:$0xff]  }
   0xc   :  { %v195_v44 = vmax.f32 %v179_v34, 0.0  ;;  %v196_v45 = vmax.f32 %v180_v35, 0.0  ;;  %v249_v55 = vunpack.c.l.bf16 %v301_v42  ;;  %v281_v56 = vunpack.c.l.bf16 %v308_v43 }
   0xd   :  { %213 = vst [vmem:[%s534_s6 + $0x10] sm:$0xff] %v197_v48  ;;  %v183_v58 = vadd.f32 %v167_v50, %v89_v49  ;;  %v90_v59 = vadd.f32 %v367_v6, %v67_v51  ;;  %v250_v60 = vunpack.c.h.bf16 %v301_v42  ;;  %v282_v61 = vunpack.c.h.bf16 %v308_v43  ;;  %214 = vst [vmem:[%s534_s6 + $0x18] sm:$0xff] %v198_v53 }
   0xe   :  { %211 = vst [vmem:[%s534_s6] sm:$0xff] %v195_v44  ;;  %212 = vst [vmem:[%s534_s6 + $0x8] sm:$0xff] %v196_v45  ;;  %v168_v62 = vadd.f32 %v379_v12, %v145_v54  ;;  %v68_v63 = vmul.f32 %v249_v55, %v354_v1  ;;  %v146_v0 = vmul.f32 %v281_v56, %v362_v4  ;;  %v253_v2 = vunpack.c.l.bf16 %v302_v52  ;;  %v312_v55 = vld [vmem:[%s531_s3 + $0x38] sm:$0xff]  }
   0xf   :  { %v199_v3 = vmax.f32 %v183_v58, 0.0  ;;  %v69_v5 = vmul.f32 %v250_v60, %v354_v1  ;;  %v147_v7 = vmul.f32 %v282_v61, %v362_v4  ;;  %v285_v8 = vunpack.c.l.bf16 %v309_v57 }
  0x10   :  { %v184_v9 = vadd.f32 %v168_v62, %v90_v59  ;;  %v91_v10 = vadd.f32 %v367_v6, %v68_v63  ;;  %v169_v11 = vadd.f32 %v379_v12, %v146_v0  ;;  %v70_v13 = vmul.f32 %v253_v2, %v354_v1 }
  0x11   :  { %215 = vst [vmem:[%s534_s6 + $0x20] sm:$0xff] %v199_v3  ;;  %v92_v15 = vadd.f32 %v367_v6, %v69_v5  ;;  %v170_v16 = vadd.f32 %v379_v12, %v147_v7  ;;  %v148_v17 = vmul.f32 %v285_v8, %v362_v4  ;;  %v254_v18 = vunpack.c.h.bf16 %v302_v52 }
  0x12   :  { %v200_v20 = vmax.f32 %v184_v9, 0.0  ;;  %v185_v21 = vadd.f32 %v169_v11, %v91_v10  ;;  %v93_v22 = vadd.f32 %v367_v6, %v70_v13  ;;  %v286_v23 = vunpack.c.h.bf16 %v309_v57 }
  0x13   :  { %v186_v24 = vadd.f32 %v170_v16, %v92_v15  ;;  %v171_v25 = vadd.f32 %v379_v12, %v148_v17  ;;  %v71_v26 = vmul.f32 %v254_v18, %v354_v1  ;;  %v257_v27 = vunpack.c.l.bf16 %v303_v14 }
  0x14   :  { %216 = vst [vmem:[%s534_s6 + $0x28] sm:$0xff] %v200_v20  ;;  %v201_v28 = vmax.f32 %v185_v21, 0.0  ;;  %v149_v29 = vmul.f32 %v286_v23, %v362_v4  ;;  %v289_v30 = vunpack.c.l.bf16 %v310_v19  ;;  %v258_v31 = vunpack.c.h.bf16 %v303_v14 }
  0x15   :  { %v202_v34 = vmax.f32 %v186_v24, 0.0  ;;  %v187_v35 = vadd.f32 %v171_v25, %v93_v22  ;;  %v94_v36 = vadd.f32 %v367_v6, %v71_v26  ;;  %v72_v37 = vmul.f32 %v257_v27, %v354_v1 }
  0x16   :  { %217 = vst [vmem:[%s534_s6 + $0x30] sm:$0xff] %v201_v28  ;;  %v172_v38 = vadd.f32 %v379_v12, %v149_v29  ;;  %v150_v39 = vmul.f32 %v289_v30, %v362_v4  ;;  %v73_v40 = vmul.f32 %v258_v31, %v354_v1  ;;  %v290_v41 = vunpack.c.h.bf16 %v310_v19 }
  0x17   :  { %218 = vst [vmem:[%s534_s6 + $0x38] sm:$0xff] %v202_v34  ;;  %v203_v42 = vmax.f32 %v187_v35, 0.0  ;;  %v95_v43 = vadd.f32 %v367_v6, %v72_v37  ;;  %v261_v44 = vunpack.c.l.bf16 %v304_v32  ;;  %v293_v45 = vunpack.c.l.bf16 %v311_v33 }
  0x18   :  { %v188_v47 = vadd.f32 %v172_v38, %v94_v36  ;;  %v173_v48 = vadd.f32 %v379_v12, %v150_v39  ;;  %v96_v49 = vadd.f32 %v367_v6, %v73_v40  ;;  %v151_v50 = vmul.f32 %v290_v41, %v362_v4 }
  0x19   :  { %219 = vst [vmem:[%s534_s6 + $0x40] sm:$0xff] %v203_v42  ;;  %v74_v51 = vmul.f32 %v261_v44, %v354_v1  ;;  %v152_v52 = vmul.f32 %v293_v45, %v362_v4  ;;  %v262_v53 = vunpack.c.h.bf16 %v304_v32  ;;  %v294_v54 = vunpack.c.h.bf16 %v311_v33 }
  0x1a   :  { %v204_v56 = vmax.f32 %v188_v47, 0.0  ;;  %v189_v57 = vadd.f32 %v173_v48, %v95_v43  ;;  %v174_v58 = vadd.f32 %v379_v12, %v151_v50  ;;  %v265_v59 = vunpack.c.l.bf16 %v305_v46 }
  0x1b   :  { %v97_v60 = vadd.f32 %v367_v6, %v74_v51  ;;  %v175_v61 = vadd.f32 %v379_v12, %v152_v52  ;;  %v75_v62 = vmul.f32 %v262_v53, %v354_v1  ;;  %v153_v63 = vmul.f32 %v294_v54, %v362_v4 }
  0x1c   :  { %220 = vst [vmem:[%s534_s6 + $0x48] sm:$0xff] %v204_v56  ;;  %v205_v0 = vmax.f32 %v189_v57, 0.0  ;;  %v190_v2 = vadd.f32 %v174_v58, %v96_v49  ;;  %v76_v3 = vmul.f32 %v265_v59, %v354_v1  ;;  %v297_v5 = vunpack.c.l.bf16 %v312_v55 }
  0x1d   :  { %v191_v7 = vadd.f32 %v175_v61, %v97_v60  ;;  %v98_v8 = vadd.f32 %v367_v6, %v75_v62  ;;  %v176_v9 = vadd.f32 %v379_v12, %v153_v63  ;;  %v266_v10 = vunpack.c.h.bf16 %v305_v46 }
  0x1e   :  { %221 = vst [vmem:[%s534_s6 + $0x50] sm:$0xff] %v205_v0  ;;  %v206_v11 = vmax.f32 %v190_v2, 0.0  ;;  %v99_v13 = vadd.f32 %v367_v6, %v76_v3  ;;  %v154_v14 = vmul.f32 %v297_v5, %v362_v4  ;;  %v298_v15 = vunpack.c.h.bf16 %v312_v55 }
  0x1f   :  { %v207_v16 = vmax.f32 %v191_v7, 0.0  ;;  %v192_v17 = vadd.f32 %v176_v9, %v98_v8  ;;  %v77_v18 = vmul.f32 %v266_v10, %v354_v1 }
  0x20   :  { %222 = vst [vmem:[%s534_s6 + $0x58] sm:$0xff] %v206_v11  ;;  %v177_v19 = vadd.f32 %v379_v12, %v154_v14  ;;  %v155_v20 = vmul.f32 %v298_v15, %v362_v4 }
  0x21   :  { %223 = vst [vmem:[%s534_s6 + $0x60] sm:$0xff] %v207_v16  ;;  %v208_v21 = vmax.f32 %v192_v17, 0.0  ;;  %v100_v22 = vadd.f32 %v367_v6, %v77_v18 }
  0x22   :  { %v193_v23 = vadd.f32 %v177_v19, %v99_v13  ;;  %v178_v24 = vadd.f32 %v379_v12, %v155_v20 }
  0x23   :  { %224 = vst [vmem:[%s534_s6 + $0x68] sm:$0xff] %v208_v21 }
  0x24   :  { %v209_v1 = vmax.f32 %v193_v23, 0.0  ;;  %v194_v25 = vadd.f32 %v178_v24, %v100_v22 }
  0x26   :  { %225 = vst [vmem:[%s534_s6 + $0x70] sm:$0xff] %v209_v1  ;;  %v210_v4 = vmax.f32 %v194_v25, 0.0 }
  0x28   :  { %226 = vst [vmem:[%s534_s6 + $0x78] sm:$0xff] %v210_v4 }

// kernel: basic_block_forward.6
= control target key start
LH: loop header
LB: loop body
LE: loop exit
PB: predicated region body
PF: predicated region fallthrough
CT: control target
= control target key end

     0   :  { %s757_s1 = inlined_call_operand.vmem [shape: bf16[128,128], index: 1, kind: input, shape index: {}]   ;;  %s758_s0 = inlined_call_operand.vmem [shape: bf16[128,128], index: 0, kind: input, shape index: {}]   ;;  %s759_s2 = inlined_call_operand.vmem [shape: bf16[128,128], index: 2, kind: output, shape index: {0}]   ;;  %s760_s3 = inlined_call_operand.vmem [shape: f32[1,1,128], index: 3, kind: output, shape index: {1}]   ;;  %s761_s4 = inlined_call_operand.vmem [shape: f32[1,1,128], index: 4, kind: output, shape index: {2}]  }
   0x1   :  { %v638_v0 = vld [vmem:[%s757_s1 + $0x38] sm:$0xff]   ;;  %v639_v1 = vld [vmem:[%s757_s1 + $0x30] sm:$0xff]   ;;  %v640_v2 = vld [vmem:[%s757_s1 + $0x28] sm:$0xff]  }
   0x2   :  { %590 = vmatprep.subr.bf16.mxu0 %v638_v0  ;;  %622 = vmatprep.subr.bf16.mxu1 %v638_v0  ;;  %v641_v3 = vld [vmem:[%s757_s1 + $0x20] sm:$0xff]   ;;  %v642_v5 = vld [vmem:[%s757_s1 + $0x18] sm:$0xff]   ;;  %v643_v7 = vld [vmem:[%s757_s1 + $0x10] sm:$0xff]  }
   0x3   :  { %591 = vmatpush3.bf16.msra.mxu0 %v638_v0  ;;  %630 = vmatpush3.bf16.msra.mxu1 %v638_v0  ;;  %v646_v4 = vld [vmem:[%s758_s0] sm:$0xff]   ;;  %v644_v8 = vld [vmem:[%s757_s1 + $0x8] sm:$0xff]   ;;  %v648_v12 = vld [vmem:[%s758_s0 + $0x10] sm:$0xff]  }
   0x4   :  { %592 = vmatprep.subr.bf16.mxu0 %v639_v1  ;;  %623 = vmatprep.subr.bf16.mxu1 %v639_v1  ;;  %v650_v6 = vld [vmem:[%s758_s0 + $0x20] sm:$0xff]   ;;  %v647_v10 = vld [vmem:[%s758_s0 + $0x8] sm:$0xff]   ;;  %v652_v13 = vld [vmem:[%s758_s0 + $0x30] sm:$0xff]  }
   0x5   :  { %606 = vmatprep.mubr.bf16.mxu0 %v646_v4  ;;  %614 = vmatprep.mubr.bf16.mxu1 %v650_v6  ;;  %v645_v9 = vld [vmem:[%s757_s1] sm:$0xff]   ;;  %v651_v11 = vld [vmem:[%s758_s0 + $0x28] sm:$0xff]   ;;  %v649_v14 = vld [vmem:[%s758_s0 + $0x18] sm:$0xff]  }
   0x6   :  { %v653_v15 = vld [vmem:[%s758_s0 + $0x38] sm:$0xff]  }
   0x7   :  { %593 = vmatpush3.bf16.msra.mxu0 %v639_v1  ;;  %631 = vmatpush3.bf16.msra.mxu1 %v639_v1 }
   0x8   :  { %594 = vmatprep.subr.bf16.mxu0 %v640_v2  ;;  %624 = vmatprep.subr.bf16.mxu1 %v640_v2 }
   0xb   :  { %595 = vmatpush3.bf16.msra.mxu0 %v640_v2  ;;  %632 = vmatpush3.bf16.msra.mxu1 %v640_v2 }
   0xc   :  { %596 = vmatprep.subr.bf16.mxu0 %v641_v3  ;;  %625 = vmatprep.subr.bf16.mxu1 %v641_v3 }
   0xf   :  { %597 = vmatpush3.bf16.msra.mxu0 %v641_v3  ;;  %633 = vmatpush3.bf16.msra.mxu1 %v641_v3 }
  0x10   :  { %598 = vmatprep.subr.bf16.mxu0 %v642_v5  ;;  %626 = vmatprep.subr.bf16.mxu1 %v642_v5 }
  0x13   :  { %599 = vmatpush3.bf16.msra.mxu0 %v642_v5  ;;  %634 = vmatpush3.bf16.msra.mxu1 %v642_v5 }
  0x14   :  { %600 = vmatprep.subr.bf16.mxu0 %v643_v7  ;;  %627 = vmatprep.subr.bf16.mxu1 %v643_v7 }
  0x17   :  { %601 = vmatpush3.bf16.msra.mxu0 %v643_v7  ;;  %635 = vmatpush3.bf16.msra.mxu1 %v643_v7 }
  0x18   :  { %602 = vmatprep.subr.bf16.mxu0 %v644_v8  ;;  %628 = vmatprep.subr.bf16.mxu1 %v644_v8 }
  0x1b   :  { %603 = vmatpush3.bf16.msra.mxu0 %v644_v8  ;;  %636 = vmatpush3.bf16.msra.mxu1 %v644_v8 }
  0x1c   :  { %604 = vmatprep.subr.bf16.mxu0 %v645_v9  ;;  %629 = vmatprep.subr.bf16.mxu1 %v645_v9 }
  0x1f   :  { %605 = vmatpush3.bf16.msra.mxu0 %v645_v9  ;;  %637 = vmatpush3.bf16.msra.mxu1 %v645_v9 }
  0x22   :  { %607 = vmatmul.mubr.bf16.vlgmr.msra.gmra.mxu0 %v647_v10  ;;  %615 = vmatmul.mubr.bf16.vlgmr.msra.gmra.mxu1 %v651_v11 }
  0x23   :  { %610 = vmatprep.mubr.bf16.mxu0 %v648_v12  ;;  %618 = vmatprep.mubr.bf16.mxu1 %v652_v13 }
  0x2a   :  { %611 = vmatmul.mubr.bf16.gmra.mxu0 %v649_v14  ;;  %619 = vmatmul.mubr.bf16.gmra.mxu1 %v653_v15 }
  0xe2   :  { %v608_v16 = vpop.f32.mrf.mxu0  ;;  %v616_v17 = vpop.f32.mrf.mxu1 }
  0xe3   :  { %v431_v33 = vmul.f32 %v608_v16, %v608_v16  ;;  %v439_v3 = vmul.f32 %v616_v17, %v616_v17 }
  0xe4   :  { %v213_v18 = vpop.f32.mrf.mxu0  ;;  %v245_v19 = vpop.f32.mrf.mxu1 }
  0xe5   :  { %v429_v24 = vmul.f32 %v213_v18, %v213_v18  ;;  %v437_v61 = vmul.f32 %v245_v19, %v245_v19 }
  0xe6   :  { %v609_v20 = vpop.f32.mrf.mxu0  ;;  %v617_v21 = vpop.f32.mrf.mxu1 }
  0xe7   :  { %v535_v22 = vpack.c.bf16 %v609_v20, %v608_v16  ;;  %v555_v23 = vpack.c.bf16 %v617_v21, %v616_v17  ;;  %v432_v38 = vmul.f32 %v609_v20, %v609_v20  ;;  %v440_v6 = vmul.f32 %v617_v21, %v617_v21 }
  0xe8   :  { %v216_v25 = vpop.f32.mrf.mxu0  ;;  %v248_v26 = vpop.f32.mrf.mxu1 }
  0xe9   :  { %567 = vst [vmem:[%s759_s2 + $0x8] sm:$0xff] %v535_v22   ;;  %v530_v27 = vpack.c.bf16 %v216_v25, %v213_v18  ;;  %v407_v28 = vadd.f32 %v216_v25, %v213_v18  ;;  %v430_v29 = vmul.f32 %v216_v25, %v216_v25  ;;  %571 = vst [vmem:[%s759_s2 + $0x28] sm:$0xff] %v555_v23  }
  0xea   :  { %v550_v30 = vpack.c.bf16 %v248_v26, %v245_v19  ;;  %v612_v31 = vpop.f32.mrf.mxu0  ;;  %v620_v32 = vpop.f32.mrf.mxu1  ;;  %v438_v1 = vmul.f32 %v248_v26, %v248_v26 }
  0xeb   :  { %531 = vst [vmem:[%s759_s2] sm:$0xff] %v530_v27   ;;  %v408_v34 = vadd.f32 %v608_v16, %v407_v28  ;;  %v445_v35 = vadd.f32 %v430_v29, %v429_v24  ;;  %v435_v55 = vmul.f32 %v612_v31, %v612_v31  ;;  %v443_v15 = vmul.f32 %v620_v32, %v620_v32 }
  0xec   :  { %570 = vst [vmem:[%s759_s2 + $0x20] sm:$0xff] %v550_v30   ;;  %v229_v36 = vpop.f32.mrf.mxu0  ;;  %v261_v37 = vpop.f32.mrf.mxu1 }
  0xed   :  { %v446_v39 = vadd.f32 %v445_v35, %v431_v33  ;;  %v409_v40 = vadd.f32 %v609_v20, %v408_v34  ;;  %v433_v44 = vmul.f32 %v229_v36, %v229_v36  ;;  %v441_v10 = vmul.f32 %v261_v37, %v261_v37 }
  0xee   :  { %v613_v41 = vpop.f32.mrf.mxu0  ;;  %v621_v42 = vpop.f32.mrf.mxu1 }
  0xef   :  { %v410_v43 = vadd.f32 %v409_v40, %v229_v36  ;;  %v447_v45 = vadd.f32 %v446_v39, %v432_v38  ;;  %v545_v46 = vpack.c.bf16 %v613_v41, %v612_v31  ;;  %v565_v48 = vpack.c.bf16 %v621_v42, %v620_v32 }
  0xf0   :  { %v232_v47 = vpop.f32.mrf.mxu0  ;;  %v264_v49 = vpop.f32.mrf.mxu1  ;;  %v436_v58 = vmul.f32 %v613_v41, %v613_v41  ;;  %v444_v20 = vmul.f32 %v621_v42, %v621_v42 }
  0xf1   :  { %v448_v50 = vadd.f32 %v447_v45, %v433_v44  ;;  %569 = vst [vmem:[%s759_s2 + $0x18] sm:$0xff] %v545_v46   ;;  %v540_v51 = vpack.c.bf16 %v232_v47, %v229_v36  ;;  %v411_v52 = vadd.f32 %v410_v43, %v232_v47  ;;  %v434_v53 = vmul.f32 %v232_v47, %v232_v47 }
  0xf2   :  { %573 = vst [vmem:[%s759_s2 + $0x38] sm:$0xff] %v565_v48   ;;  %v560_v54 = vpack.c.bf16 %v264_v49, %v261_v37  ;;  %v442_v14 = vmul.f32 %v264_v49, %v264_v49 }
  0xf3   :  { %568 = vst [vmem:[%s759_s2 + $0x10] sm:$0xff] %v540_v51   ;;  %v412_v56 = vadd.f32 %v612_v31, %v411_v52  ;;  %v449_v57 = vadd.f32 %v448_v50, %v434_v53 }
  0xf4   :  { %572 = vst [vmem:[%s759_s2 + $0x30] sm:$0xff] %v560_v54  }
  0xf5   :  { %v413_v59 = vadd.f32 %v613_v41, %v412_v56  ;;  %v450_v60 = vadd.f32 %v449_v57, %v435_v55 }
  0xf7   :  { %v451_v62 = vadd.f32 %v450_v60, %v436_v58  ;;  %v414_v63 = vadd.f32 %v413_v59, %v245_v19 }
  0xf9   :  { %v415_v0 = vadd.f32 %v414_v63, %v248_v26  ;;  %v452_v2 = vadd.f32 %v451_v62, %v437_v61 }
  0xfb   :  { %v416_v4 = vadd.f32 %v616_v17, %v415_v0  ;;  %v453_v5 = vadd.f32 %v452_v2, %v438_v1 }
  0xfd   :  { %v454_v7 = vadd.f32 %v453_v5, %v439_v3  ;;  %v417_v8 = vadd.f32 %v617_v21, %v416_v4 }
  0xff   :  { %v418_v9 = vadd.f32 %v417_v8, %v261_v37  ;;  %v455_v11 = vadd.f32 %v454_v7, %v440_v6 }
 0x101   :  { %v456_v12 = vadd.f32 %v455_v11, %v441_v10  ;;  %v419_v13 = vadd.f32 %v418_v9, %v264_v49 }
 0x103   :  { %v420_v16 = vadd.f32 %v620_v32, %v419_v13  ;;  %v457_v18 = vadd.f32 %v456_v12, %v442_v14 }
 0x105   :  { %v421_v19 = vadd.f32 %v621_v42, %v420_v16  ;;  %v458_v22 = vadd.f32 %v457_v18, %v443_v15 }
 0x107   :  { %v422_v23 = vrot.slane %v421_v19, 4  ;;  %v459_v24 = vadd.f32 %v458_v22, %v444_v20 }
 0x109   :  { %v423_v25 = vadd.f32 %v422_v23, %v421_v19  ;;  %v460_v17 = vrot.slane %v459_v24, 4 }
 0x10b   :  { %v424_v26 = vrot.slane %v423_v25, 2  ;;  %v461_v27 = vadd.f32 %v460_v17, %v459_v24 }
 0x10d   :  { %v425_v28 = vadd.f32 %v424_v26, %v423_v25  ;;  %v462_v21 = vrot.slane %v461_v27, 2 }
 0x10f   :  { %v426_v29 = vrot.slane %v425_v28, 1  ;;  %v463_v30 = vadd.f32 %v462_v21, %v461_v27 }
 0x111   :  { %v427_v31 = vadd.f32 %v426_v29, %v425_v28  ;;  %v464_v33 = vrot.slane %v463_v30, 1 }
 0x113   :  { %428 = vst [vmem:[%s760_s3] sm:$0x1] %v427_v31  ;;  %v465_v32 = vadd.f32 %v464_v33, %v463_v30 }
 0x115   :  { %466 = vst [vmem:[%s761_s4] sm:$0x1] %v465_v32 }

</bundles_post_ra>
